<compile_context>
chip_gen: v7x
topology: tpu7x:2x2x1
jax: 0.10.0
libtpu: 0.0.40
codegen_flags: <defaults>
</compile_context>

<pallas_src>
import functools

import numpy as np

import jax
import jax.numpy as jnp
from jax.experimental import pallas as pl
from jax.experimental.pallas import tpu as pltpu


# ----------------------------------------------------------------------------
# Static helpers (trace-time / numpy, no runtime HBM passes).
# ----------------------------------------------------------------------------
def _tap_offsets(D, H, W):
    """Flattened-voxel index delta for each of the 27 conv taps (kd,kh,kw)."""
    offs = []
    for kd in range(3):
        for kh in range(3):
            for kw in range(3):
                offs.append((kd - 1) * H * W + (kh - 1) * W + (kw - 1))
    return tuple(offs)


def _tap_masks(D, H, W):
    """(27, D*H*W) float32 validity masks reproducing zero-padding=1."""
    dd, hh, ww = np.meshgrid(np.arange(D), np.arange(H), np.arange(W),
                             indexing="ij")
    rows = []
    for kd in range(3):
        for kh in range(3):
            for kw in range(3):
                od, oh, ow = kd - 1, kh - 1, kw - 1
                valid = ((dd + od >= 0) & (dd + od < D) &
                         (hh + oh >= 0) & (hh + oh < H) &
                         (ww + ow >= 0) & (ww + ow < W))
                rows.append(valid.reshape(-1))
    return np.stack(rows, axis=0).astype(np.float32)


def _leaky_relu(v, slope):
    return jnp.where(v > 0, v, slope * v)


# ----------------------------------------------------------------------------
# Fused generator kernel (one batch element per grid step).
# ----------------------------------------------------------------------------
def _generator_kernel(x_ref, noise_ref, mask_ref, a1_ref, b1_ref,
                      w2_ref, b2_ref, sw_ref, sb_ref, fw_ref, fb_ref,
                      o_ref, *, dhw, cin_x, slope, offsets):
    b = pl.program_id(0)
    mask = mask_ref[...]                                  # (27, dhw)

    # ---- noise_processor conv1 on a spatially-constant field --------------
    # noise.dim()==2 branch: channel 0 of the noise vector, broadcast in space.
    # Response of conv1 to a unit constant field (a1 = W1_im2col @ mask) is
    # precomputed in the wrapper; here just scale + bias + LeakyReLU.
    nval = noise_ref[b, 0]
    h1 = _leaky_relu(nval * a1_ref[...] + b1_ref[...], slope)        # (8, dhw)

    # ---- noise_processor conv2: contract channels first (one MXU matmul),
    #      then apply the 27 zero-padded taps as masked lane rolls (XLU). ----
    g = jnp.dot(w2_ref[...], h1, preferred_element_type=jnp.float32)  # (27,dhw)
    proc = jnp.zeros((1, dhw), jnp.float32)
    for t, delta in enumerate(offsets):
        row = g[t:t + 1, :]
        if delta != 0:
            row = pltpu.roll(row, shift=(-delta) % dhw, axis=1)
        proc = proc + row * mask[t:t + 1, :]
    proc = _leaky_relu(proc + b2_ref[...], slope)                      # (1,dhw)

    # ---- SwinUNETR stub: 1x1x1 projection, K = cin_x+1 (tiny) -> VPU MACs --
    # (also fuses torch.cat([x, processed_noise]) -- no concat materialized)
    x2 = x_ref[0]                                         # (cin_x, dhw)
    acc = sw_ref[:, cin_x:cin_x + 1] * proc               # noise channel
    for c in range(cin_x):
        acc = acc + sw_ref[:, c:c + 1] * x2[c:c + 1, :]
    feats = acc + sb_ref[...]                             # (F, dhw)

    # ---- final_conv: 1x1x1, feature_size -> out_channels (MXU, lane-dense) -
    out = (jnp.dot(fw_ref[...], feats, preferred_element_type=jnp.float32)
           + fb_ref[...])                                 # (Cout, dhw)
    o_ref[...] = out[None]                                # (1, Cout, dhw)


# ----------------------------------------------------------------------------
# Params & forward wrapper.
# ----------------------------------------------------------------------------
def init_generator_params(key, in_channels=1, out_channels=1, feature_size=24,
                          noise_dim=16):
    ks = jax.random.split(key, 8)
    actual_in = in_channels + 1                      # use_noise=True
    p = {
        # noise_processor: Conv3d(1,8,3,p=1) -> LReLU -> Conv3d(8,1,3,p=1) -> LReLU
        "np_w1": 0.1 * jax.random.normal(ks[0], (8, 1, 3, 3, 3), jnp.float32),
        "np_b1": 0.1 * jax.random.normal(ks[1], (8,), jnp.float32),
        "np_w2": 0.1 * jax.random.normal(ks[2], (1, 8, 3, 3, 3), jnp.float32),
        "np_b2": 0.1 * jax.random.normal(ks[3], (1,), jnp.float32),
        # SwinUNETR stub: 1x1x1 linear projection actual_in -> feature_size.
        "swin_w": 0.1 * jax.random.normal(ks[4], (actual_in, feature_size), jnp.float32),
        "swin_b": 0.1 * jax.random.normal(ks[5], (feature_size,), jnp.float32),
        # final_conv: Conv3d(feature_size, out_channels, kernel_size=1)
        "final_w": 0.1 * jax.random.normal(ks[6], (feature_size, out_channels), jnp.float32),
        "final_b": 0.1 * jax.random.normal(ks[7], (out_channels,), jnp.float32),
    }
    p["noise_dim"] = noise_dim
    return p


def generator_forward(params, x, noise, slope=0.2):
    """x: (B, in_channels, D, H, W); noise: (B, noise_dim) -> (B, out_ch, D, H, W)."""
    B, Cin, D, H, W = x.shape
    dhw = D * H * W
    F = params["swin_w"].shape[1]
    Cout = params["final_w"].shape[1]

    mask = jnp.asarray(_tap_masks(D, H, W))                     # (27, dhw)
    offsets = _tap_offsets(D, H, W)

    # --- tiny, once-per-call (batch-invariant) weight re-layouts ---
    w1 = params["np_w1"]
    w2 = params["np_w2"]
    c1o, c1i = w1.shape[0], w1.shape[1]
    c2o, c2i = w2.shape[0], w2.shape[1]
    assert c1i == 1 and c2o == 1, "noise_processor has fixed 1->8->1 channels"
    # conv1 response to a unit constant field with zero padding: (8, dhw).
    w1_2d = w1.reshape(c1o, 27).astype(jnp.float32)
    a1 = jnp.dot(w1_2d, mask)                                   # (c1o, dhw)
    # conv2 weights, taps-major layout for channels-first contraction: (27, 8).
    w2t = jnp.transpose(w2.reshape(c2o, c2i, 27), (2, 1, 0)) \
             .reshape(27, c2i).astype(jnp.float32)
    b1 = params["np_b1"].reshape(c1o, 1).astype(jnp.float32)
    b2 = params["np_b2"].reshape(c2o, 1).astype(jnp.float32)
    sw = jnp.transpose(params["swin_w"]).astype(jnp.float32)    # (F, Cin+1)
    sb = params["swin_b"].reshape(F, 1).astype(jnp.float32)
    fw = jnp.transpose(params["final_w"]).astype(jnp.float32)   # (Cout, F)
    fb = params["final_b"].reshape(Cout, 1).astype(jnp.float32)

    # Contiguous reshape only (no transpose / pad / concat HBM passes).
    x3 = x.reshape(B, Cin, dhw).astype(jnp.float32)
    noise_f = noise.astype(jnp.float32)

    kern = functools.partial(_generator_kernel, dhw=dhw, cin_x=Cin,
                             slope=slope, offsets=offsets)

    def _full(arr):
        shape = arr.shape
        return pl.BlockSpec(shape, lambda b, _s=shape: (0,) * len(_s))

    out = pl.pallas_call(
        kern,
        out_shape=jax.ShapeDtypeStruct((B, Cout, dhw), jnp.float32),
        grid=(B,),
        in_specs=[
            pl.BlockSpec((1, Cin, dhw), lambda b: (b, 0, 0)),            # x
            pl.BlockSpec(memory_space=pltpu.MemorySpace.SMEM),           # noise
            _full(mask),                                                 # tap masks
            _full(a1), _full(b1),                                        # conv1 (folded)
            _full(w2t), _full(b2),                                       # conv2
            _full(sw), _full(sb),                                        # swin stub
            _full(fw), _full(fb),                                        # final conv
        ],
        out_specs=pl.BlockSpec((1, Cout, dhw), lambda b: (b, 0, 0)),
        compiler_params=pltpu.CompilerParams(
            dimension_semantics=("parallel",)),
    )(x3, noise_f, mask, a1, b1, w2t, b2, sw, sb, fw, fb)

    return out.reshape(B, Cout, D, H, W)


# ----------------------------------------------------------------------------
# Pure-JAX reference (for a correctness check).
# ----------------------------------------------------------------------------
def _reference_forward(params, x, noise, slope=0.2):
    B, Cin, D, H, W = x.shape

    def conv3(v, w, b):
        y = jax.lax.conv_general_dilated(
            v, w.astype(jnp.float32), (1, 1, 1), [(1, 1)] * 3,
            dimension_numbers=("NCDHW", "OIDHW", "NCDHW"))
        return jax.nn.leaky_relu(y + b.reshape(1, -1, 1, 1, 1), slope)

    noise_3d = jnp.broadcast_to(noise[:, 0:1, None, None, None],
                                (B, 1, D, H, W)).astype(jnp.float32)
    h1 = conv3(noise_3d, params["np_w1"], params["np_b1"])
    proc = conv3(h1, params["np_w2"], params["np_b2"])
    xcat = jnp.concatenate([x.astype(jnp.float32), proc], axis=1)
    feats = (jnp.einsum("bcdhw,cf->bfdhw", xcat, params["swin_w"])
             + params["swin_b"].reshape(1, -1, 1, 1, 1))
    out = (jnp.einsum("bfdhw,fo->bodhw", feats, params["final_w"])
           + params["final_b"].reshape(1, -1, 1, 1, 1))
    return out


if __name__ == "__main__":
    key = jax.random.PRNGKey(0)
    k_x, k_n, k_p = jax.random.split(key, 3)

    B, Cin, D, H, W = 2, 1, 8, 8, 8
    noise_dim = 16

    x = jax.random.normal(k_x, (B, Cin, D, H, W), jnp.float32)
    noise = jax.random.normal(k_n, (B, noise_dim), jnp.float32)
    params = init_generator_params(k_p, in_channels=Cin, out_channels=1,
                                   feature_size=24, noise_dim=noise_dim)

    out = generator_forward(params, x, noise)
    out = jax.block_until_ready(out)

    assert out.shape == (B, 1, D, H, W), out.shape
    assert bool(jnp.all(jnp.isfinite(out)))

    ref = jax.block_until_ready(_reference_forward(params, x, noise))
    err = float(jnp.max(jnp.abs(out - ref)))
    assert err < 1e-4, f"max abs error vs reference: {err}"

    print("KERNEL_OK")
</pallas_src>

<mosaic_0001>
module attributes {stable_mosaic.version = 11 : i64} {
  func.func @_generator_kernel(%arg0: i32, %arg1: memref<1x1x512xf32, #tpu.memory_space<vmem>>, %arg2: memref<2x16xf32, #tpu.memory_space<smem>>, %arg3: memref<27x512xf32, #tpu.memory_space<vmem>>, %arg4: memref<8x512xf32, #tpu.memory_space<vmem>>, %arg5: memref<8x1xf32, #tpu.memory_space<vmem>>, %arg6: memref<27x8xf32, #tpu.memory_space<vmem>>, %arg7: memref<1x1xf32, #tpu.memory_space<vmem>>, %arg8: memref<24x2xf32, #tpu.memory_space<vmem>>, %arg9: memref<24x1xf32, #tpu.memory_space<vmem>>, %arg10: memref<1x24xf32, #tpu.memory_space<vmem>>, %arg11: memref<1x1xf32, #tpu.memory_space<vmem>>, %arg12: memref<1x1x512xf32, #tpu.memory_space<vmem>>) attributes {dimension_semantics = [#tpu.dimension_semantics<parallel>], iteration_bounds = array<i64: 2>, scalar_prefetch = 0 : i64, scratch_operands = 0 : i64, tpu.core_type = #tpu.core_type<tc>, window_params = [{transform_indices = @transform_0, window_bounds = array<i64: 1, 1, 512>}, {transform_indices = @transform_1, window_bounds = array<i64: 2, 16>}, {pipeline_mode = #tpu.pipeline_mode<synchronous>, transform_indices = @transform_2, window_bounds = array<i64: 27, 512>}, {pipeline_mode = #tpu.pipeline_mode<synchronous>, transform_indices = @transform_3, window_bounds = array<i64: 8, 512>}, {pipeline_mode = #tpu.pipeline_mode<synchronous>, transform_indices = @transform_4, window_bounds = array<i64: 8, 1>}, {pipeline_mode = #tpu.pipeline_mode<synchronous>, transform_indices = @transform_5, window_bounds = array<i64: 27, 8>}, {pipeline_mode = #tpu.pipeline_mode<synchronous>, transform_indices = @transform_6, window_bounds = array<i64: 1, 1>}, {pipeline_mode = #tpu.pipeline_mode<synchronous>, transform_indices = @transform_7, window_bounds = array<i64: 24, 2>}, {pipeline_mode = #tpu.pipeline_mode<synchronous>, transform_indices = @transform_8, window_bounds = array<i64: 24, 1>}, {pipeline_mode = #tpu.pipeline_mode<synchronous>, transform_indices = @transform_9, window_bounds = array<i64: 1, 24>}, {pipeline_mode = #tpu.pipeline_mode<synchronous>, transform_indices = @transform_10, window_bounds = array<i64: 1, 1>}, {transform_indices = @transform_11, window_bounds = array<i64: 1, 1, 512>}]} {
    %c0 = arith.constant 0 : index
    %c0_0 = arith.constant 0 : index
    %0 = vector.load %arg3[%c0, %c0_0] : memref<27x512xf32, #tpu.memory_space<vmem>>, vector<27x512xf32>
    %1 = arith.index_cast %arg0 : i32 to index
    %c0_1 = arith.constant 0 : index
    %2 = memref.load %arg2[%1, %c0_1] : memref<2x16xf32, #tpu.memory_space<smem>>
    %c0_2 = arith.constant 0 : index
    %c0_3 = arith.constant 0 : index
    %3 = vector.load %arg4[%c0_2, %c0_3] : memref<8x512xf32, #tpu.memory_space<vmem>>, vector<8x512xf32>
    %4 = vector.broadcast %2 : f32 to vector<8x512xf32>
    %5 = arith.mulf %4, %3 : vector<8x512xf32>
    %c0_4 = arith.constant 0 : index
    %c0_5 = arith.constant 0 : index
    %6 = vector.load %arg5[%c0_4, %c0_5] : memref<8x1xf32, #tpu.memory_space<vmem>>, vector<8x1xf32>
    %7 = vector.broadcast %6 : vector<8x1xf32> to vector<8x512xf32>
    %8 = arith.addf %5, %7 : vector<8x512xf32>
    %cst = arith.constant 0.000000e+00 : f32
    %9 = vector.broadcast %cst : f32 to vector<8x512xf32>
    %10 = arith.cmpf ogt, %8, %9 : vector<8x512xf32>
    %cst_6 = arith.constant 2.000000e-01 : f32
    %11 = vector.broadcast %cst_6 : f32 to vector<8x512xf32>
    %12 = arith.mulf %11, %8 : vector<8x512xf32>
    %13 = arith.select %10, %8, %12 : vector<8x512xi1>, vector<8x512xf32>
    %c0_7 = arith.constant 0 : index
    %c0_8 = arith.constant 0 : index
    %14 = vector.load %arg6[%c0_7, %c0_8] : memref<27x8xf32, #tpu.memory_space<vmem>>, vector<27x8xf32>
    %cst_9 = arith.constant dense<0.000000e+00> : vector<27x512xf32>
    %15 = tpu.matmul %14, %13, %cst_9 {dimension_numbers = #tpu.dot_dimension_numbers<[1], [0], [0], [1], [0, 0, 1, 1], [], []>} : vector<27x8xf32>, vector<8x512xf32>, vector<27x512xf32> -> vector<27x512xf32>
    %cst_10 = arith.constant 0.000000e+00 : f32
    %16 = vector.broadcast %cst_10 : f32 to vector<1x512xf32>
    %17 = vector.extract_strided_slice %15 {offsets = [0, 0], sizes = [1, 512], strides = [1, 1]} : vector<27x512xf32> to vector<1x512xf32>
    %c73_i32 = arith.constant 73 : i32
    %18 = tpu.dynamic_rotate %17 by %c73_i32 dim 1 : vector<1x512xf32>, i32 -> vector<1x512xf32>
    %19 = vector.extract_strided_slice %0 {offsets = [0, 0], sizes = [1, 512], strides = [1, 1]} : vector<27x512xf32> to vector<1x512xf32>
    %20 = arith.mulf %18, %19 : vector<1x512xf32>
    %21 = arith.addf %16, %20 : vector<1x512xf32>
    %22 = vector.extract_strided_slice %15 {offsets = [1, 0], sizes = [1, 512], strides = [1, 1]} : vector<27x512xf32> to vector<1x512xf32>
    %c72_i32 = arith.constant 72 : i32
    %23 = tpu.dynamic_rotate %22 by %c72_i32 dim 1 : vector<1x512xf32>, i32 -> vector<1x512xf32>
    %24 = vector.extract_strided_slice %0 {offsets = [1, 0], sizes = [1, 512], strides = [1, 1]} : vector<27x512xf32> to vector<1x512xf32>
    %25 = arith.mulf %23, %24 : vector<1x512xf32>
    %26 = arith.addf %21, %25 : vector<1x512xf32>
    %27 = vector.extract_strided_slice %15 {offsets = [2, 0], sizes = [1, 512], strides = [1, 1]} : vector<27x512xf32> to vector<1x512xf32>
    %c71_i32 = arith.constant 71 : i32
    %28 = tpu.dynamic_rotate %27 by %c71_i32 dim 1 : vector<1x512xf32>, i32 -> vector<1x512xf32>
    %29 = vector.extract_strided_slice %0 {offsets = [2, 0], sizes = [1, 512], strides = [1, 1]} : vector<27x512xf32> to vector<1x512xf32>
    %30 = arith.mulf %28, %29 : vector<1x512xf32>
    %31 = arith.addf %26, %30 : vector<1x512xf32>
    %32 = vector.extract_strided_slice %15 {offsets = [3, 0], sizes = [1, 512], strides = [1, 1]} : vector<27x512xf32> to vector<1x512xf32>
    %c65_i32 = arith.constant 65 : i32
    %33 = tpu.dynamic_rotate %32 by %c65_i32 dim 1 : vector<1x512xf32>, i32 -> vector<1x512xf32>
    %34 = vector.extract_strided_slice %0 {offsets = [3, 0], sizes = [1, 512], strides = [1, 1]} : vector<27x512xf32> to vector<1x512xf32>
    %35 = arith.mulf %33, %34 : vector<1x512xf32>
    %36 = arith.addf %31, %35 : vector<1x512xf32>
    %37 = vector.extract_strided_slice %15 {offsets = [4, 0], sizes = [1, 512], strides = [1, 1]} : vector<27x512xf32> to vector<1x512xf32>
    %c64_i32 = arith.constant 64 : i32
    %38 = tpu.dynamic_rotate %37 by %c64_i32 dim 1 : vector<1x512xf32>, i32 -> vector<1x512xf32>
    %39 = vector.extract_strided_slice %0 {offsets = [4, 0], sizes = [1, 512], strides = [1, 1]} : vector<27x512xf32> to vector<1x512xf32>
    %40 = arith.mulf %38, %39 : vector<1x512xf32>
    %41 = arith.addf %36, %40 : vector<1x512xf32>
    %42 = vector.extract_strided_slice %15 {offsets = [5, 0], sizes = [1, 512], strides = [1, 1]} : vector<27x512xf32> to vector<1x512xf32>
    %c63_i32 = arith.constant 63 : i32
    %43 = tpu.dynamic_rotate %42 by %c63_i32 dim 1 : vector<1x512xf32>, i32 -> vector<1x512xf32>
    %44 = vector.extract_strided_slice %0 {offsets = [5, 0], sizes = [1, 512], strides = [1, 1]} : vector<27x512xf32> to vector<1x512xf32>
    %45 = arith.mulf %43, %44 : vector<1x512xf32>
    %46 = arith.addf %41, %45 : vector<1x512xf32>
    %47 = vector.extract_strided_slice %15 {offsets = [6, 0], sizes = [1, 512], strides = [1, 1]} : vector<27x512xf32> to vector<1x512xf32>
    %c57_i32 = arith.constant 57 : i32
    %48 = tpu.dynamic_rotate %47 by %c57_i32 dim 1 : vector<1x512xf32>, i32 -> vector<1x512xf32>
    %49 = vector.extract_strided_slice %0 {offsets = [6, 0], sizes = [1, 512], strides = [1, 1]} : vector<27x512xf32> to vector<1x512xf32>
    %50 = arith.mulf %48, %49 : vector<1x512xf32>
    %51 = arith.addf %46, %50 : vector<1x512xf32>
    %52 = vector.extract_strided_slice %15 {offsets = [7, 0], sizes = [1, 512], strides = [1, 1]} : vector<27x512xf32> to vector<1x512xf32>
    %c56_i32 = arith.constant 56 : i32
    %53 = tpu.dynamic_rotate %52 by %c56_i32 dim 1 : vector<1x512xf32>, i32 -> vector<1x512xf32>
    %54 = vector.extract_strided_slice %0 {offsets = [7, 0], sizes = [1, 512], strides = [1, 1]} : vector<27x512xf32> to vector<1x512xf32>
    %55 = arith.mulf %53, %54 : vector<1x512xf32>
    %56 = arith.addf %51, %55 : vector<1x512xf32>
    %57 = vector.extract_strided_slice %15 {offsets = [8, 0], sizes = [1, 512], strides = [1, 1]} : vector<27x512xf32> to vector<1x512xf32>
    %c55_i32 = arith.constant 55 : i32
    %58 = tpu.dynamic_rotate %57 by %c55_i32 dim 1 : vector<1x512xf32>, i32 -> vector<1x512xf32>
    %59 = vector.extract_strided_slice %0 {offsets = [8, 0], sizes = [1, 512], strides = [1, 1]} : vector<27x512xf32> to vector<1x512xf32>
    %60 = arith.mulf %58, %59 : vector<1x512xf32>
    %61 = arith.addf %56, %60 : vector<1x512xf32>
    %62 = vector.extract_strided_slice %15 {offsets = [9, 0], sizes = [1, 512], strides = [1, 1]} : vector<27x512xf32> to vector<1x512xf32>
    %c9_i32 = arith.constant 9 : i32
    %63 = tpu.dynamic_rotate %62 by %c9_i32 dim 1 : vector<1x512xf32>, i32 -> vector<1x512xf32>
    %64 = vector.extract_strided_slice %0 {offsets = [9, 0], sizes = [1, 512], strides = [1, 1]} : vector<27x512xf32> to vector<1x512xf32>
    %65 = arith.mulf %63, %64 : vector<1x512xf32>
    %66 = arith.addf %61, %65 : vector<1x512xf32>
    %67 = vector.extract_strided_slice %15 {offsets = [10, 0], sizes = [1, 512], strides = [1, 1]} : vector<27x512xf32> to vector<1x512xf32>
    %c8_i32 = arith.constant 8 : i32
    %68 = tpu.dynamic_rotate %67 by %c8_i32 dim 1 : vector<1x512xf32>, i32 -> vector<1x512xf32>
    %69 = vector.extract_strided_slice %0 {offsets = [10, 0], sizes = [1, 512], strides = [1, 1]} : vector<27x512xf32> to vector<1x512xf32>
    %70 = arith.mulf %68, %69 : vector<1x512xf32>
    %71 = arith.addf %66, %70 : vector<1x512xf32>
    %72 = vector.extract_strided_slice %15 {offsets = [11, 0], sizes = [1, 512], strides = [1, 1]} : vector<27x512xf32> to vector<1x512xf32>
    %c7_i32 = arith.constant 7 : i32
    %73 = tpu.dynamic_rotate %72 by %c7_i32 dim 1 : vector<1x512xf32>, i32 -> vector<1x512xf32>
    %74 = vector.extract_strided_slice %0 {offsets = [11, 0], sizes = [1, 512], strides = [1, 1]} : vector<27x512xf32> to vector<1x512xf32>
    %75 = arith.mulf %73, %74 : vector<1x512xf32>
    %76 = arith.addf %71, %75 : vector<1x512xf32>
    %77 = vector.extract_strided_slice %15 {offsets = [12, 0], sizes = [1, 512], strides = [1, 1]} : vector<27x512xf32> to vector<1x512xf32>
    %c1_i32 = arith.constant 1 : i32
    %78 = tpu.dynamic_rotate %77 by %c1_i32 dim 1 : vector<1x512xf32>, i32 -> vector<1x512xf32>
    %79 = vector.extract_strided_slice %0 {offsets = [12, 0], sizes = [1, 512], strides = [1, 1]} : vector<27x512xf32> to vector<1x512xf32>
    %80 = arith.mulf %78, %79 : vector<1x512xf32>
    %81 = arith.addf %76, %80 : vector<1x512xf32>
    %82 = vector.extract_strided_slice %15 {offsets = [13, 0], sizes = [1, 512], strides = [1, 1]} : vector<27x512xf32> to vector<1x512xf32>
    %83 = vector.extract_strided_slice %0 {offsets = [13, 0], sizes = [1, 512], strides = [1, 1]} : vector<27x512xf32> to vector<1x512xf32>
    %84 = arith.mulf %82, %83 : vector<1x512xf32>
    %85 = arith.addf %81, %84 : vector<1x512xf32>
    %86 = vector.extract_strided_slice %15 {offsets = [14, 0], sizes = [1, 512], strides = [1, 1]} : vector<27x512xf32> to vector<1x512xf32>
    %c511_i32 = arith.constant 511 : i32
    %87 = tpu.dynamic_rotate %86 by %c511_i32 dim 1 : vector<1x512xf32>, i32 -> vector<1x512xf32>
    %88 = vector.extract_strided_slice %0 {offsets = [14, 0], sizes = [1, 512], strides = [1, 1]} : vector<27x512xf32> to vector<1x512xf32>
    %89 = arith.mulf %87, %88 : vector<1x512xf32>
    %90 = arith.addf %85, %89 : vector<1x512xf32>
    %91 = vector.extract_strided_slice %15 {offsets = [15, 0], sizes = [1, 512], strides = [1, 1]} : vector<27x512xf32> to vector<1x512xf32>
    %c505_i32 = arith.constant 505 : i32
    %92 = tpu.dynamic_rotate %91 by %c505_i32 dim 1 : vector<1x512xf32>, i32 -> vector<1x512xf32>
    %93 = vector.extract_strided_slice %0 {offsets = [15, 0], sizes = [1, 512], strides = [1, 1]} : vector<27x512xf32> to vector<1x512xf32>
    %94 = arith.mulf %92, %93 : vector<1x512xf32>
    %95 = arith.addf %90, %94 : vector<1x512xf32>
    %96 = vector.extract_strided_slice %15 {offsets = [16, 0], sizes = [1, 512], strides = [1, 1]} : vector<27x512xf32> to vector<1x512xf32>
    %c504_i32 = arith.constant 504 : i32
    %97 = tpu.dynamic_rotate %96 by %c504_i32 dim 1 : vector<1x512xf32>, i32 -> vector<1x512xf32>
    %98 = vector.extract_strided_slice %0 {offsets = [16, 0], sizes = [1, 512], strides = [1, 1]} : vector<27x512xf32> to vector<1x512xf32>
    %99 = arith.mulf %97, %98 : vector<1x512xf32>
    %100 = arith.addf %95, %99 : vector<1x512xf32>
    %101 = vector.extract_strided_slice %15 {offsets = [17, 0], sizes = [1, 512], strides = [1, 1]} : vector<27x512xf32> to vector<1x512xf32>
    %c503_i32 = arith.constant 503 : i32
    %102 = tpu.dynamic_rotate %101 by %c503_i32 dim 1 : vector<1x512xf32>, i32 -> vector<1x512xf32>
    %103 = vector.extract_strided_slice %0 {offsets = [17, 0], sizes = [1, 512], strides = [1, 1]} : vector<27x512xf32> to vector<1x512xf32>
    %104 = arith.mulf %102, %103 : vector<1x512xf32>
    %105 = arith.addf %100, %104 : vector<1x512xf32>
    %106 = vector.extract_strided_slice %15 {offsets = [18, 0], sizes = [1, 512], strides = [1, 1]} : vector<27x512xf32> to vector<1x512xf32>
    %c457_i32 = arith.constant 457 : i32
    %107 = tpu.dynamic_rotate %106 by %c457_i32 dim 1 : vector<1x512xf32>, i32 -> vector<1x512xf32>
    %108 = vector.extract_strided_slice %0 {offsets = [18, 0], sizes = [1, 512], strides = [1, 1]} : vector<27x512xf32> to vector<1x512xf32>
    %109 = arith.mulf %107, %108 : vector<1x512xf32>
    %110 = arith.addf %105, %109 : vector<1x512xf32>
    %111 = vector.extract_strided_slice %15 {offsets = [19, 0], sizes = [1, 512], strides = [1, 1]} : vector<27x512xf32> to vector<1x512xf32>
    %c456_i32 = arith.constant 456 : i32
    %112 = tpu.dynamic_rotate %111 by %c456_i32 dim 1 : vector<1x512xf32>, i32 -> vector<1x512xf32>
    %113 = vector.extract_strided_slice %0 {offsets = [19, 0], sizes = [1, 512], strides = [1, 1]} : vector<27x512xf32> to vector<1x512xf32>
    %114 = arith.mulf %112, %113 : vector<1x512xf32>
    %115 = arith.addf %110, %114 : vector<1x512xf32>
    %116 = vector.extract_strided_slice %15 {offsets = [20, 0], sizes = [1, 512], strides = [1, 1]} : vector<27x512xf32> to vector<1x512xf32>
    %c455_i32 = arith.constant 455 : i32
    %117 = tpu.dynamic_rotate %116 by %c455_i32 dim 1 : vector<1x512xf32>, i32 -> vector<1x512xf32>
    %118 = vector.extract_strided_slice %0 {offsets = [20, 0], sizes = [1, 512], strides = [1, 1]} : vector<27x512xf32> to vector<1x512xf32>
    %119 = arith.mulf %117, %118 : vector<1x512xf32>
    %120 = arith.addf %115, %119 : vector<1x512xf32>
    %121 = vector.extract_strided_slice %15 {offsets = [21, 0], sizes = [1, 512], strides = [1, 1]} : vector<27x512xf32> to vector<1x512xf32>
    %c449_i32 = arith.constant 449 : i32
    %122 = tpu.dynamic_rotate %121 by %c449_i32 dim 1 : vector<1x512xf32>, i32 -> vector<1x512xf32>
    %123 = vector.extract_strided_slice %0 {offsets = [21, 0], sizes = [1, 512], strides = [1, 1]} : vector<27x512xf32> to vector<1x512xf32>
    %124 = arith.mulf %122, %123 : vector<1x512xf32>
    %125 = arith.addf %120, %124 : vector<1x512xf32>
    %126 = vector.extract_strided_slice %15 {offsets = [22, 0], sizes = [1, 512], strides = [1, 1]} : vector<27x512xf32> to vector<1x512xf32>
    %c448_i32 = arith.constant 448 : i32
    %127 = tpu.dynamic_rotate %126 by %c448_i32 dim 1 : vector<1x512xf32>, i32 -> vector<1x512xf32>
    %128 = vector.extract_strided_slice %0 {offsets = [22, 0], sizes = [1, 512], strides = [1, 1]} : vector<27x512xf32> to vector<1x512xf32>
    %129 = arith.mulf %127, %128 : vector<1x512xf32>
    %130 = arith.addf %125, %129 : vector<1x512xf32>
    %131 = vector.extract_strided_slice %15 {offsets = [23, 0], sizes = [1, 512], strides = [1, 1]} : vector<27x512xf32> to vector<1x512xf32>
    %c447_i32 = arith.constant 447 : i32
    %132 = tpu.dynamic_rotate %131 by %c447_i32 dim 1 : vector<1x512xf32>, i32 -> vector<1x512xf32>
    %133 = vector.extract_strided_slice %0 {offsets = [23, 0], sizes = [1, 512], strides = [1, 1]} : vector<27x512xf32> to vector<1x512xf32>
    %134 = arith.mulf %132, %133 : vector<1x512xf32>
    %135 = arith.addf %130, %134 : vector<1x512xf32>
    %136 = vector.extract_strided_slice %15 {offsets = [24, 0], sizes = [1, 512], strides = [1, 1]} : vector<27x512xf32> to vector<1x512xf32>
    %c441_i32 = arith.constant 441 : i32
    %137 = tpu.dynamic_rotate %136 by %c441_i32 dim 1 : vector<1x512xf32>, i32 -> vector<1x512xf32>
    %138 = vector.extract_strided_slice %0 {offsets = [24, 0], sizes = [1, 512], strides = [1, 1]} : vector<27x512xf32> to vector<1x512xf32>
    %139 = arith.mulf %137, %138 : vector<1x512xf32>
    %140 = arith.addf %135, %139 : vector<1x512xf32>
    %141 = vector.extract_strided_slice %15 {offsets = [25, 0], sizes = [1, 512], strides = [1, 1]} : vector<27x512xf32> to vector<1x512xf32>
    %c440_i32 = arith.constant 440 : i32
    %142 = tpu.dynamic_rotate %141 by %c440_i32 dim 1 : vector<1x512xf32>, i32 -> vector<1x512xf32>
    %143 = vector.extract_strided_slice %0 {offsets = [25, 0], sizes = [1, 512], strides = [1, 1]} : vector<27x512xf32> to vector<1x512xf32>
    %144 = arith.mulf %142, %143 : vector<1x512xf32>
    %145 = arith.addf %140, %144 : vector<1x512xf32>
    %146 = vector.extract_strided_slice %15 {offsets = [26, 0], sizes = [1, 512], strides = [1, 1]} : vector<27x512xf32> to vector<1x512xf32>
    %c439_i32 = arith.constant 439 : i32
    %147 = tpu.dynamic_rotate %146 by %c439_i32 dim 1 : vector<1x512xf32>, i32 -> vector<1x512xf32>
    %148 = vector.extract_strided_slice %0 {offsets = [26, 0], sizes = [1, 512], strides = [1, 1]} : vector<27x512xf32> to vector<1x512xf32>
    %149 = arith.mulf %147, %148 : vector<1x512xf32>
    %150 = arith.addf %145, %149 : vector<1x512xf32>
    %c0_11 = arith.constant 0 : index
    %c0_12 = arith.constant 0 : index
    %151 = vector.load %arg7[%c0_11, %c0_12] : memref<1x1xf32, #tpu.memory_space<vmem>>, vector<1x1xf32>
    %152 = vector.broadcast %151 : vector<1x1xf32> to vector<1x512xf32>
    %153 = arith.addf %150, %152 : vector<1x512xf32>
    %cst_13 = arith.constant 0.000000e+00 : f32
    %154 = vector.broadcast %cst_13 : f32 to vector<1x512xf32>
    %155 = arith.cmpf ogt, %153, %154 : vector<1x512xf32>
    %cst_14 = arith.constant 2.000000e-01 : f32
    %156 = vector.broadcast %cst_14 : f32 to vector<1x512xf32>
    %157 = arith.mulf %156, %153 : vector<1x512xf32>
    %158 = arith.select %155, %153, %157 : vector<1x512xi1>, vector<1x512xf32>
    %c0_15 = arith.constant 0 : index
    %c0_16 = arith.constant 0 : index
    %c0_17 = arith.constant 0 : index
    %159 = vector.load %arg1[%c0_15, %c0_16, %c0_17] : memref<1x1x512xf32, #tpu.memory_space<vmem>>, vector<1x1x512xf32>
    %160 = vector.shape_cast %159 : vector<1x1x512xf32> to vector<1x512xf32>
    %c0_18 = arith.constant 0 : index
    %c1 = arith.constant 1 : index
    %161 = vector.load %arg8[%c0_18, %c1] : memref<24x2xf32, #tpu.memory_space<vmem>>, vector<24x1xf32>
    %162 = vector.broadcast %161 : vector<24x1xf32> to vector<24x512xf32>
    %163 = vector.broadcast %158 : vector<1x512xf32> to vector<24x512xf32>
    %164 = arith.mulf %162, %163 : vector<24x512xf32>
    %c0_19 = arith.constant 0 : index
    %c0_20 = arith.constant 0 : index
    %165 = vector.load %arg8[%c0_19, %c0_20] : memref<24x2xf32, #tpu.memory_space<vmem>>, vector<24x1xf32>
    %166 = vector.broadcast %165 : vector<24x1xf32> to vector<24x512xf32>
    %167 = vector.broadcast %160 : vector<1x512xf32> to vector<24x512xf32>
    %168 = arith.mulf %166, %167 : vector<24x512xf32>
    %169 = arith.addf %164, %168 : vector<24x512xf32>
    %c0_21 = arith.constant 0 : index
    %c0_22 = arith.constant 0 : index
    %170 = vector.load %arg9[%c0_21, %c0_22] : memref<24x1xf32, #tpu.memory_space<vmem>>, vector<24x1xf32>
    %171 = vector.broadcast %170 : vector<24x1xf32> to vector<24x512xf32>
    %172 = arith.addf %169, %171 : vector<24x512xf32>
    %c0_23 = arith.constant 0 : index
    %c0_24 = arith.constant 0 : index
    %173 = vector.load %arg10[%c0_23, %c0_24] : memref<1x24xf32, #tpu.memory_space<vmem>>, vector<1x24xf32>
    %cst_25 = arith.constant dense<0.000000e+00> : vector<1x512xf32>
    %174 = tpu.matmul %173, %172, %cst_25 {dimension_numbers = #tpu.dot_dimension_numbers<[1], [0], [0], [1], [0, 0, 1, 1], [], []>} : vector<1x24xf32>, vector<24x512xf32>, vector<1x512xf32> -> vector<1x512xf32>
    %c0_26 = arith.constant 0 : index
    %c0_27 = arith.constant 0 : index
    %175 = vector.load %arg11[%c0_26, %c0_27] : memref<1x1xf32, #tpu.memory_space<vmem>>, vector<1x1xf32>
    %176 = vector.broadcast %175 : vector<1x1xf32> to vector<1x512xf32>
    %177 = arith.addf %174, %176 : vector<1x512xf32>
    %178 = vector.shape_cast %177 : vector<1x512xf32> to vector<1x1x512xf32>
    %c0_28 = arith.constant 0 : index
    %c0_29 = arith.constant 0 : index
    %c0_30 = arith.constant 0 : index
    %179 = vector.load %arg12[%c0_28, %c0_29, %c0_30] : memref<1x1x512xf32, #tpu.memory_space<vmem>>, vector<1x1x512xf32>
    tpu.vector_store %arg12[%c0_28, %c0_29, %c0_30], %178 {strides = array<i32>} : memref<1x1x512xf32, #tpu.memory_space<vmem>>, vector<1x1x512xf32>,
    return
  }
  func.func @transform_0(%arg0: i32) -> (i32, i32, i32) {
    %c0_i32 = arith.constant 0 : i32
    %c0_i32_0 = arith.constant 0 : i32
    %c0_i32_1 = arith.constant 0 : i32
    return %arg0, %c0_i32, %c0_i32_0 : i32, i32, i32
  }
  func.func @transform_1(%arg0: i32) -> (i32, i32) {
    %c0_i32 = arith.constant 0 : i32
    %c0_i32_0 = arith.constant 0 : i32
    %c0_i32_1 = arith.constant 0 : i32
    return %c0_i32, %c0_i32_0 : i32, i32
  }
  func.func @transform_2(%arg0: i32) -> (i32, i32) {
    %c0_i32 = arith.constant 0 : i32
    %c0_i32_0 = arith.constant 0 : i32
    %c0_i32_1 = arith.constant 0 : i32
    return %c0_i32, %c0_i32_0 : i32, i32
  }
  func.func @transform_3(%arg0: i32) -> (i32, i32) {
    %c0_i32 = arith.constant 0 : i32
    %c0_i32_0 = arith.constant 0 : i32
    %c0_i32_1 = arith.constant 0 : i32
    return %c0_i32, %c0_i32_0 : i32, i32
  }
  func.func @transform_4(%arg0: i32) -> (i32, i32) {
    %c0_i32 = arith.constant 0 : i32
    %c0_i32_0 = arith.constant 0 : i32
    %c0_i32_1 = arith.constant 0 : i32
    return %c0_i32, %c0_i32_0 : i32, i32
  }
  func.func @transform_5(%arg0: i32) -> (i32, i32) {
    %c0_i32 = arith.constant 0 : i32
    %c0_i32_0 = arith.constant 0 : i32
    %c0_i32_1 = arith.constant 0 : i32
    return %c0_i32, %c0_i32_0 : i32, i32
  }
  func.func @transform_6(%arg0: i32) -> (i32, i32) {
    %c0_i32 = arith.constant 0 : i32
    %c0_i32_0 = arith.constant 0 : i32
    %c0_i32_1 = arith.constant 0 : i32
    return %c0_i32, %c0_i32_0 : i32, i32
  }
  func.func @transform_7(%arg0: i32) -> (i32, i32) {
    %c0_i32 = arith.constant 0 : i32
    %c0_i32_0 = arith.constant 0 : i32
    %c0_i32_1 = arith.constant 0 : i32
    return %c0_i32, %c0_i32_0 : i32, i32
  }
  func.func @transform_8(%arg0: i32) -> (i32, i32) {
    %c0_i32 = arith.constant 0 : i32
    %c0_i32_0 = arith.constant 0 : i32
    %c0_i32_1 = arith.constant 0 : i32
    return %c0_i32, %c0_i32_0 : i32, i32
  }
  func.func @transform_9(%arg0: i32) -> (i32, i32) {
    %c0_i32 = arith.constant 0 : i32
    %c0_i32_0 = arith.constant 0 : i32
    %c0_i32_1 = arith.constant 0 : i32
    return %c0_i32, %c0_i32_0 : i32, i32
  }
  func.func @transform_10(%arg0: i32) -> (i32, i32) {
    %c0_i32 = arith.constant 0 : i32
    %c0_i32_0 = arith.constant 0 : i32
    %c0_i32_1 = arith.constant 0 : i32
    return %c0_i32, %c0_i32_0 : i32, i32
  }
  func.func @transform_11(%arg0: i32) -> (i32, i32, i32) {
    %c0_i32 = arith.constant 0 : i32
    %c0_i32_0 = arith.constant 0 : i32
    %c0_i32_1 = arith.constant 0 : i32
    return %arg0, %c0_i32, %c0_i32_0 : i32, i32, i32
  }
}

</mosaic_0001>

<bundles_post_ra>
// kernel: tpu_custom_call.1
= control target key start
LH: loop header
LB: loop body
LE: loop exit
PB: predicated region body
PF: predicated region fallthrough
CT: control target
= control target key end

     0   :  { %s3435_s0 = inlined_call_operand.vmem [shape: f32[2,1,512], index: 0, kind: input, shape index: {}]   ;;  %s3436_s1 = inlined_call_operand.vmem [shape: f32[2,16], index: 1, kind: input, shape index: {}]   ;;  %s3437_s2 = inlined_call_operand.hbm [shape: f32[27,512], index: 2, kind: input, shape index: {}]   ;;  %s3438_s3 = inlined_call_operand.vmem [shape: f32[8,512], index: 3, kind: input, shape index: {}]   ;;  %s3439_s4 = inlined_call_operand.vmem [shape: f32[8,1], index: 4, kind: input, shape index: {}]   ;;  %s3440_s5 = inlined_call_operand.vmem [shape: f32[27,8], index: 5, kind: input, shape index: {}]   ;;  %s3441_s6 = inlined_call_operand.<no memory space> [shape: f32[1,1], index: 6, kind: input, shape index: {}]   ;;  %s3442_s7 = inlined_call_operand.vmem [shape: f32[24,2], index: 7, kind: input, shape index: {}]   ;;  %s3443_s8 = inlined_call_operand.vmem [shape: f32[24,1], index: 8, kind: input, shape index: {}]   ;;  %s3444_s9 = inlined_call_operand.vmem [shape: f32[1,24], index: 9, kind: input, shape index: {}]   ;;  %s3445_s11 = inlined_call_operand.hbm [shape: f32[2,1,512], index: 11, kind: output, shape index: {}]   ;;  %s3446_s10 = inlined_call_operand.<no memory space> [shape: f32[1,1], index: 10, kind: input, shape index: {}]  }
   0x1   :  { %v16_v0 = vstv %s3441_s6  ;;  %v18_v1 = vstv %s3446_s10 }
   0x2   :  { %17 = vst [vmem:[#allocation2] sm:$0x1] %v16_v0  ;;  %19 = vst [vmem:[#allocation3] sm:$0x1] %v18_v1 }
   0x3   :  { %20 = vsyncpa [#allocation7], 0 }
   0x4   :  { %21 = vsyncpa [#allocation5], 0 }
   0x5   :  { %22 = vsyncpa [#allocation6], 0 }
   0x6   :  { %24 = vsyncpa [#allocation6 + $0x1], 0  ;;  %s2385_s21 = smov 0   ;;  %s2387_s22 = smov 0  }
   0x7   :  { %s2389_s23 = smov 0   ;;  %s2391_s24 = smov 0  }
   0x8 LB: > { %s2406_s6 = sadd.s32 4294967295, %s2291_s24   ;;  %s2051_s10 = sadd.s32 4294967294, %s2291_s24   ;;  %s2291_s24 = sphi %s2391_s24, %s3492_s24   ;;  %s2287_s23 = sphi %s2389_s23, %s3491_s23   ;;  %s2283_s22 = sphi %s2387_s22, %s3490_s22   ;;  %s2279_s21 = sphi %s2385_s21, %s3489_s21  }
   0x9   : > { %s2410_s25 = sadd.s32 1, %s2291_s24   ;;  %s273_s26 = sadd.s32 1, %s2287_s23 }
   0xa   : > { %s270_s27 = ssub.s32 %s2291_s24, %s2410_s25  ;;  %p283_p0 = scmp.ne.s32.totalorder %s2287_s23, %s2283_s22 }
   0xb   : > { %p271_p1 = scmp.eq.s32.totalorder %s270_s27, 0  ;;  %p284_p2 = scmp.eq.s32.totalorder %s2406_s6, 1 }
   0xc   : > { %p289_p3 = scmp.ne.s32.totalorder %s2283_s22, %s2279_s21  ;;  %p290_p4 = scmp.eq.s32.totalorder %s2051_s10, 1 }
   0xd   : > { %s2421_s28 = scalar_select %p271_p1, %s2287_s23, %s273_s26  }
   0xe   : > { %p2423_p5 = por %p284_p2, %p283_p0  ;;  %p2427_p6 = por %p290_p4, %p289_p3 }
   0xf   : > { %p2052_p7 = scmp.ge.s32.totalorder %s2291_s24, 1  ;;  %p297_p8 = scmp.lt.s32.totalorder %s2291_s24, 3 }
  0x10   : > { %s3454_s30 = scalar_select %p2427_p6, 1, 0 }
  0x11   : > { %p3447_p9 = scmp.eq.s32.totalorder %s2406_s6, 0  ;;  %p2434_p10 = pnand %p2052_p7, %p297_p8 }
  0x12   : > { %s310_s15 = sshll.u32 %s3436_s1, 4  ;;  %s2293_s16 = smov [#allocation8]   ;;  %s311_s15 = int_to_ptr.vmem [resolvable:$true] %s310_s15 }
  0x13   : > { %p2096_p11 = pneg %p2434_p10  ;;  %s320_s17 = sshll.u32 %s2293_s16, 4  ;;  %s2449_s17 = int_to_ptr.vmem [resolvable:$true] %s320_s17 }
  0x14   : > { %s2178_s19 = scalar_lea.vmem %s311_s15, 32  ;;  %p2186_p3 = scmp.lt.s32.totalorder %s311_s15, %s311_s15 }
  0x15   : > { %p2445_p12 = pnand %p3447_p9, %p2096_p11  ;;  %p2179_p13 = scmp.ne.s32.totalorder %s311_s15, %s2178_s19 }
  0x16   : > { %p2187_p4 = scmp.lt.s32.totalorder %s2178_s19, %s2178_s19 }
  0x17   : > { %p2180_p0 = pneg %p2445_p12 }
  0x18   : > { %p2188_p7 = por %p2187_p4, %p2186_p3 }
  0x19   : > { %p2181_p1 = pnand %p2180_p0, %p2179_p13 }
  0x1b   : > { %p2182_p2 = pneg %p2181_p1 }
  0x1d   : > { %p2189_p8 = pnand %p2188_p7, %p2182_p2 }
  0x1f   : > { %2192 = shalt.err (!%p2189_p8)
}
  0x20   : > { %s2294_s20 = smov [#allocation4]   ;;  %s2193_s27 = scalar_lea.hbm %s3437_s2, 2048 }
  0x21   : > { %2099 = dma.vmem_to_smem (!%p2445_p12), %s311_s15, 32, %s2294_s20, [#allocation7]  }
  0x22   : > { %p2194_p11 = scmp.ne.s32.totalorder %s3437_s2, %s2193_s27  ;;  %p2200_p2 = scmp.lt.u32.totalorder %s2193_s27, %s3437_s2 }
  0x24   : > { %p2196_p13 = pnand %p2194_p11, %p2180_p0 }
  0x26   : > { %p2197_p1 = pneg %p2196_p13 }
  0x28   : > { %p2202_p3 = pnand %p2200_p2, %p2197_p1 }
  0x2a   : > { %2205 = shalt.err (!%p2202_p3)
}
  0x2b   : > { %s2206_s15 = scalar_lea.vmem %s2449_s17, 2048  ;;  %p2214_p9 = scmp.lt.s32.totalorder %s2449_s17, %s2449_s17 }
  0x2c   : > { %p2207_p4 = scmp.ne.s32.totalorder %s2449_s17, %s2206_s15  ;;  %p2215_p11 = scmp.lt.s32.totalorder %s2206_s15, %s2206_s15 }
  0x2e   : > { %p2209_p7 = pnand %p2207_p4, %p2180_p0  ;;  %p2216_p13 = por %p2215_p11, %p2214_p9 }
  0x30   : > { %p2210_p8 = pneg %p2209_p7 }
  0x32   : > { %p2217_p6 = pnand %p2216_p13, %p2210_p8 }
  0x34   : > { %2220 = shalt.err (!%p2217_p6)
}
  0x35   : > { %s2295_s20 = smov 512   ;;  %s2296_s10 = smov 32  }
  0x36   : > { %2102 = dma.hbm_to_vmem [thread:$0]  (!%p2445_p12), %s3437_s2, 2048, %s2449_s17, [#allocation5], %s2295_s20, %s2295_s20, %s2296_s10  }
  0x37   : > { %367 = sbr.rel (%p2434_p10) target bundleno = 1009 (0x3f1), region = 64 }
  0x3e   : > { %p3457_p0 = scmp.eq.s32.totalorder %s2406_s6, 0 }
  0x40   : > { %2266 = dma.done.wait (%p3457_p0), [#allocation7], 32   ;;  %p3458_p1 = pmov %p3457_p0 }
  0x41   : > { %p3459_p6 = pmov %p3457_p0 }
  0x42   : > { %2268 = vsyncadd (%p3458_p1), [#allocation7], 4294967264 }
  0x43   : > { %2270 = dma.done.wait (%p3459_p6), [#allocation5], 2048   ;;  %p3460_p9 = pmov %p3457_p0 }
  0x45   : > { %2272 = vsyncadd (%p3460_p9), [#allocation5], 4294965248 }
  0x46   : > { %377 = sfence }
  0x47   : > { %v442_v2 = vld [vmem:[%s3439_s4] sm:$0xff]  ;;  %v3450_v3 = vmov 0   ;;  %v2298_v4 = vmov 0.0   ;;  %v3451_v7 = vmov 1   ;;  %v1630_v8 = vld [vmem:[%s3442_s7 + $0x8] sm:$0xff]  ;;  %s2061_s19 = sshll.u32 %s2406_s6, 7 }
  0x48   : > { %2169 = vset.pattern.permute.xlu0 %v3450_v3  ;;  %2170 = vset.pattern.permute.xlu1 %v3450_v3  ;;  %v1602_v5 = vld [vmem:[#allocation2] sm:$0x1]  ;;  %s432_s15 = sld [smem:[#allocation4 + %s2061_s19]]  ;;  %v434_v9 = vld [vmem:[%s3438_s3 + $0x8] sm:$0xff]  ;;  %v436_v11 = vld [vmem:[%s3438_s3 + $0x18] sm:$0xff]  ;;  %vm468_vm4 = vcmask 64512  }
  0x49   : > { %445 = vperm.xlu0 %2169, %v442_v2   ;;  %545 = vmatprep.mubr.f32.mxu0 %v2298_v4  ;;  %v1629_v6 = vld [vmem:[%s3442_s7] sm:$0xff]  ;;  %v435_v13 = vld [vmem:[%s3438_s3 + $0x10] sm:$0xff]  ;;  %v465_v32 = vld [vmem:[%s3440_s5 + $0x8] sm:$0xff]  ;;  %s2300_s18 = smov 73   ;;  %s2301_s13 = smov 72  }
  0x4a   : > { %634 = vmatprep.mubr.f32.mxu1 %v2298_v4  ;;  %1605 = vperm.xlu1 %2170, %v1602_v5   ;;  %v433_v12 = vld [vmem:[%s3438_s3] sm:$0xff]  ;;  %v466_v33 = vld [vmem:[%s3440_s5 + $0x10] sm:$0xff]  ;;  %v467_v34 = vld [vmem:[%s3440_s5 + $0x18] sm:$0x7]  ;;  %s2302_s12 = smov 71   ;;  %s2303_s17 = smov 65  }
  0x4b   : > { %v464_v29 = vld [vmem:[%s3440_s5] sm:$0xff]  ;;  %s2304_s14 = smov 64   ;;  %s2305_s16 = smov 63  }
  0x4c   : > { %s2306_s19 = smov 57   ;;  %s2308_s20 = smov 55  }
  0x4d   : > { %2171 = vset.pattern.permute.xlu0 %v3451_v7  ;;  %s2309_s10 = smov 9   ;;  %s2310_s26 = smov 8  }
  0x4e   : > { %1634 = vperm.xlu0 %2171, %v1629_v6   ;;  %2172 = vset.pattern.permute.xlu1 %v3451_v7  ;;  %v437_v10 = vstv %s432_s15  ;;  %s2307_s15 = smov 56   ;;  %s2311_s27 = smov 7  }
  0x4f   : > { %1639 = vperm.xlu1 %2172, %v1630_v8   ;;  %v439_v14 = vmul.f32 %v437_v10, %v434_v9  ;;  %v441_v15 = vmul.f32 %v437_v10, %v436_v11  ;;  %v438_v16 = vmul.f32 %v437_v10, %v433_v12  ;;  %v440_v17 = vmul.f32 %v437_v10, %v435_v13  ;;  %p411_p10 = scmp.lt.s32.totalorder %s2406_s6, 1 }
  0x52   : > { %2174 = vset.pattern.permute.xlu0 %v3450_v3 }
  0x53   : > { %2173 = vset.pattern.permute.xlu1 %v3450_v3 }
  0x54   : > { %1676 = vperm.xlu1 %2173, %v1629_v6  }
  0xc8   : > { %v446_v18 = vpop.permute.xlu0 %445 }
  0xc9   : > { %v449_v19 = vadd.f32 %v446_v18, %v439_v14  ;;  %v451_v20 = vadd.f32 %v446_v18, %v441_v15  ;;  %v448_v21 = vadd.f32 %v446_v18, %v438_v16  ;;  %v450_v22 = vadd.f32 %v446_v18, %v440_v17 }
  0xcb   : > { %vm453_vm0 = vcmp.gt.f32.partialorder %v449_v19, 0.0  ;;  %v457_v23 = vmul.f32 0.2, %v449_v19  ;;  %vm455_vm1 = vcmp.gt.f32.partialorder %v451_v20, 0.0  ;;  %v459_v24 = vmul.f32 0.2, %v451_v20 }
  0xcc   : > { %vm452_vm2 = vcmp.gt.f32.partialorder %v448_v21, 0.0  ;;  %v456_v25 = vmul.f32 0.2, %v448_v21  ;;  %vm454_vm3 = vcmp.gt.f32.partialorder %v450_v22, 0.0  ;;  %v458_v26 = vmul.f32 0.2, %v450_v22 }
  0xcd   : > { %v461_v27 = vsel %vm453_vm0, %v449_v19, %v457_v23  ;;  %v463_v28 = vsel %vm455_vm1, %v451_v20, %v459_v24 }
  0xce   : > { %481 = vmatprep.subr.mxu0 %v461_v27  ;;  %570 = vmatprep.subr.mxu1 %v463_v28  ;;  %v460_v30 = vsel %vm452_vm2, %v448_v21, %v456_v25  ;;  %v462_v31 = vsel %vm454_vm3, %v450_v22, %v458_v26 }
  0xcf   : > { %482 = vmatpush1.msra.mxu0 %v460_v30  ;;  %571 = vmatpush1.msra.mxu1 %v462_v31  ;;  %v2669_v31 = vpop.permute.xlu1 %1605 }
  0xd0   : > { %2062 = vmatmul.mubr.msk.f32.vlgmr.msra.gmra.mrb[0].mxu0 %vm468_vm4, %v464_v29  ;;  %2066 = vmatmul.mubr.msk.f32.vlgmr.msra.gmra.mrb[0].mxu1 %vm468_vm4, %v464_v29 }
  0xd1   : > { %551 = vmatprep.mubr.f32.mxu0 %v2298_v4  ;;  %640 = vmatprep.mubr.f32.mxu1 %v2298_v4 }
  0xd4   : > { %2063 = vmatmul.mubr.msk.f32.gmra.mrb[2].mxu0 %vm468_vm4, %v465_v32  ;;  %2067 = vmatmul.mubr.msk.f32.gmra.mrb[2].mxu1 %vm468_vm4, %v465_v32 }
  0xd5   : > { %557 = vmatprep.mubr.f32.mxu0 %v2298_v4  ;;  %646 = vmatprep.mubr.f32.mxu1 %v2298_v4 }
  0xd8   : > { %2064 = vmatmul.mubr.msk.f32.gmra.mrb[4].mxu0 %vm468_vm4, %v466_v33  ;;  %2068 = vmatmul.mubr.msk.f32.gmra.mrb[4].mxu1 %vm468_vm4, %v466_v33 }
  0xd9   : > { %563 = vmatprep.mubr.f32.mxu0 %v2298_v4  ;;  %652 = vmatprep.mubr.f32.mxu1 %v2298_v4 }
  0xdc   : > { %2065 = vmatmul.mubr.msk.f32.gmra.mrb[6].mxu0 %vm468_vm4, %v467_v34  ;;  %2069 = vmatmul.mubr.msk.f32.gmra.mrb[6].mxu1 %vm468_vm4, %v467_v34 }
  0xdd   : > { %1841 = vmatprep.mubr.f32.mxu0 %v2298_v4  ;;  %1912 = vmatprep.mubr.f32.mxu1 %v2298_v4 }
 0x1a3   : > { %v2551_v35 = vpop.f32.mrb[0].mxu0  ;;  %v2553_v36 = vpop.f32.mrb[0].mxu1 }
 0x1a4   : > { %663 = vrot.lane.b32.xlu1 %v2553_v36, %s2300_s18  ;;  %v2557_v37 = vpop.f32.mrb[1].mxu1  ;;  %659 = vrot.lane.b32.xlu0 %v2551_v35, %s2300_s18  ;;  %v2561_v38 = vpop.f32.mrb[1].mxu0  ;;  %v686_v43 = vrot.slane %v2551_v35, 1  ;;  %v688_v49 = vrot.slane %v2553_v36, 1  ;;  %v727_v51 = vrot.slane %v2551_v35, 2  ;;  %v729_v53 = vrot.slane %v2553_v36, 2 }
 0x1a5   : > { %v687_v44 = vrot.slane %v2561_v38, 1  ;;  %v689_v50 = vrot.slane %v2557_v37, 1  ;;  %v728_v52 = vrot.slane %v2561_v38, 2  ;;  %v730_v54 = vrot.slane %v2557_v37, 2 }
 0x1a6   : > { %v764_v55 = vrot.slane %v2551_v35, 3  ;;  %v765_v56 = vrot.slane %v2561_v38, 3  ;;  %v766_v57 = vrot.slane %v2553_v36, 3  ;;  %v767_v58 = vrot.slane %v2557_v37, 3 }
 0x1a7   : > { %v2563_v39 = vpop.f32.mrb[2].mxu0  ;;  %v2565_v40 = vpop.f32.mrb[2].mxu1  ;;  %v801_v59 = vrot.slane %v2551_v35, 4  ;;  %v802_v60 = vrot.slane %v2561_v38, 4  ;;  %v803_v61 = vrot.slane %v2553_v36, 4  ;;  %v804_v62 = vrot.slane %v2557_v37, 4 }
 0x1a8   : > { %665 = vrot.lane.b32.xlu0 %v2557_v37, %s2300_s18  ;;  %661 = vrot.lane.b32.xlu1 %v2561_v38, %s2300_s18  ;;  %v2571_v41 = vpop.f32.mrb[3].mxu0  ;;  %v2573_v42 = vpop.f32.mrb[3].mxu1  ;;  %v838_v63 = vrot.slane %v2551_v35, 5  ;;  %v839_v0 = vrot.slane %v2561_v38, 5  ;;  %v840_v1 = vrot.slane %v2553_v36, 5  ;;  %v841_v2 = vrot.slane %v2557_v37, 5 }
 0x1a9   : > { %v875_v4 = vrot.slane %v2551_v35, 6  ;;  %v876_v5 = vrot.slane %v2561_v38, 6  ;;  %v877_v6 = vrot.slane %v2553_v36, 6  ;;  %v878_v8 = vrot.slane %v2557_v37, 6 }
 0x1aa   : > { %v912_v9 = vrot.slane %v2551_v35, 7  ;;  %v913_v10 = vrot.slane %v2561_v38, 7  ;;  %v914_v12 = vrot.slane %v2553_v36, 7  ;;  %v915_v13 = vrot.slane %v2557_v37, 7  ;;  %v2675_v36 = vpop.permute.xlu1 %1639 }
 0x1ab   : > { %v2577_v45 = vpop.f32.mrb[4].mxu0  ;;  %v2579_v46 = vpop.f32.mrb[4].mxu1  ;;  %v974_v17 = vrot.slane %v2563_v39, 1  ;;  %v975_v18 = vrot.slane %v2571_v41, 1  ;;  %v976_v19 = vrot.slane %v2565_v40, 1  ;;  %v977_v20 = vrot.slane %v2573_v42, 1 }
 0x1ac   : > { %694 = vrot.lane.b32.xlu1 %v686_v43, %s2301_s13  ;;  %696 = vrot.lane.b32.xlu0 %v687_v44, %s2301_s13  ;;  %v2583_v47 = vpop.f32.mrb[5].mxu0  ;;  %v2585_v48 = vpop.f32.mrb[5].mxu1  ;;  %v1015_v21 = vrot.slane %v2563_v39, 2  ;;  %v1016_v22 = vrot.slane %v2571_v41, 2  ;;  %v1017_v23 = vrot.slane %v2565_v40, 2  ;;  %v1018_v24 = vrot.slane %v2573_v42, 2 }
 0x1ad   : > { %v1052_v25 = vrot.slane %v2563_v39, 3  ;;  %v1053_v26 = vrot.slane %v2571_v41, 3  ;;  %v1054_v27 = vrot.slane %v2565_v40, 3  ;;  %v1055_v28 = vrot.slane %v2573_v42, 3  ;;  %3461 = vst [vmem:[#allocation13_spill] sm:$0xff] %v2675_v36  ;;  %v2681_v44 = vpop.permute.xlu0 %1634 }
 0x1ae   : > { %v1089_v29 = vrot.slane %v2563_v39, 4  ;;  %v1090_v30 = vrot.slane %v2571_v41, 4  ;;  %v1091_v32 = vrot.slane %v2565_v40, 4  ;;  %v1092_v33 = vrot.slane %v2573_v42, 4  ;;  %v2679_v43 = vpop.permute.xlu1 %1676 }
 0x1af   : > { %v2633_v11 = vpop.f32.mrb[6].mxu0  ;;  %v2641_v15 = vpop.f32.mrb[6].mxu1  ;;  %v1146_v34 = vrot.slane %v2563_v39, 6  ;;  %v1147_v35 = vrot.slane %v2571_v41, 6  ;;  %v1148_v37 = vrot.slane %v2565_v40, 6  ;;  %v1149_v38 = vrot.slane %v2573_v42, 6 }
 0x1b0   : > { %698 = vrot.lane.b32.xlu1 %v688_v49, %s2301_s13  ;;  %700 = vrot.lane.b32.xlu0 %v689_v50, %s2301_s13  ;;  %v2639_v14 = vpop.f32.mrb[7].mxu0  ;;  %v2643_v16 = vpop.f32.mrb[7].mxu1  ;;  %v1183_v49 = vrot.slane %v2563_v39, 7  ;;  %v1184_v50 = vrot.slane %v2571_v41, 7 }
 0x1b4   : > { %735 = vrot.lane.b32.xlu1 %v727_v51, %s2302_s12  ;;  %737 = vrot.lane.b32.xlu0 %v728_v52, %s2302_s12 }
 0x1b8   : > { %739 = vrot.lane.b32.xlu1 %v729_v53, %s2302_s12  ;;  %741 = vrot.lane.b32.xlu0 %v730_v54, %s2302_s12  ;;  %v1185_v53 = vrot.slane %v2565_v40, 7  ;;  %v1186_v54 = vrot.slane %v2573_v42, 7 }
 0x1bc   : > { %772 = vrot.lane.b32.xlu1 %v764_v55, %s2303_s17  ;;  %774 = vrot.lane.b32.xlu0 %v765_v56, %s2303_s17 }
 0x1c0   : > { %776 = vrot.lane.b32.xlu1 %v766_v57, %s2303_s17  ;;  %778 = vrot.lane.b32.xlu0 %v767_v58, %s2303_s17 }
 0x1c4   : > { %809 = vrot.lane.b32.xlu1 %v801_v59, %s2304_s14  ;;  %811 = vrot.lane.b32.xlu0 %v802_v60, %s2304_s14  ;;  %v3448_v59 = vlaneseq }
 0x1c8   : > { %813 = vrot.lane.b32.xlu1 %v803_v61, %s2304_s14  ;;  %815 = vrot.lane.b32.xlu0 %v804_v62, %s2304_s14  ;;  %v1245_v62 = vrot.slane %v2577_v45, 1 }
 0x1cc   : > { %846 = vrot.lane.b32.xlu1 %v838_v63, %s2305_s16  ;;  %848 = vrot.lane.b32.xlu0 %v839_v0, %s2305_s16  ;;  %v2699_v63 = vand.u32 127, %v3448_v59  ;;  %v1246_v0 = vrot.slane %v2583_v47, 1 }
 0x1ce   : > { %vm669_vm5 = vcmp.lt.s32.totalorder %v2699_v63, 73  ;;  %vm702_vm6 = vcmp.lt.s32.totalorder %v2699_v63, 72  ;;  %vm743_vm7 = vcmp.lt.s32.totalorder %v2699_v63, 71  ;;  %vm780_vm8 = vcmp.lt.s32.totalorder %v2699_v63, 65 }
 0x1cf   : > { %vm817_vm9 = vcmp.lt.s32.totalorder %v2699_v63, 64  ;;  %vm854_vm10 = vcmp.lt.s32.totalorder %v2699_v63, 63  ;;  %vm891_vm11 = vcmp.lt.s32.totalorder %v2699_v63, 57  ;;  %vm928_vm12 = vcmp.lt.s32.totalorder %v2699_v63, 56 }
 0x1d0   : > { %850 = vrot.lane.b32.xlu1 %v840_v1, %s2305_s16  ;;  %852 = vrot.lane.b32.xlu0 %v841_v2, %s2305_s16  ;;  %v2702_v1 = vld [vmem:[#allocation8] sm:$0xff]  ;;  %vm957_vm13 = vcmp.lt.s32.totalorder %v2699_v63, 55  ;;  %vm990_vm14 = vcmp.lt.s32.totalorder %v2699_v63, 9  ;;  %vm1031_vm15 = vcmp.lt.s32.totalorder %v2699_v63, 8  ;;  %vm1068_vm0 = vcmp.lt.s32.totalorder %v2699_v63, 7 }
 0x1d1   : > { %vm1105_vm1 = vcmp.lt.s32.totalorder %v2699_v63, 1  ;;  %vm1162_vm2 = vcmp.lt.s32.totalorder %v2699_v63, 127  ;;  %vm1199_vm3 = vcmp.lt.s32.totalorder %v2699_v63, 121  ;;  %vm1228_vm4 = vcmp.lt.s32.totalorder %v2699_v63, 120 }
 0x1d4   : > { %883 = vrot.lane.b32.xlu1 %v875_v4, %s2306_s19  ;;  %885 = vrot.lane.b32.xlu0 %v876_v5, %s2306_s19  ;;  %v1247_v5 = vrot.slane %v2579_v46, 1 }
 0x1d8   : > { %887 = vrot.lane.b32.xlu1 %v877_v6, %s2306_s19  ;;  %889 = vrot.lane.b32.xlu0 %v878_v8, %s2306_s19  ;;  %v2708_v6 = vld [vmem:[#allocation8 + $0x18] sm:$0xff]  ;;  %v2710_v8 = vld [vmem:[#allocation8 + $0x8] sm:$0xff] }
 0x1dc   : > { %920 = vrot.lane.b32.xlu1 %v912_v9, %s2307_s15  ;;  %922 = vrot.lane.b32.xlu0 %v913_v10, %s2307_s15  ;;  %v2712_v9 = vld [vmem:[#allocation8 + $0x10] sm:$0xff]  ;;  %v1248_v10 = vrot.slane %v2585_v48, 1 }
 0x1e0   : > { %924 = vrot.lane.b32.xlu1 %v914_v12, %s2307_s15  ;;  %926 = vrot.lane.b32.xlu0 %v915_v13, %s2307_s15  ;;  %v712_v12 = vrot.slane %v2710_v8, 1  ;;  %v713_v13 = vrot.slane %v2712_v9, 1 }
 0x1e4   : > { %949 = vrot.lane.b32.xlu1 %v2563_v39, %s2308_s20  ;;  %951 = vrot.lane.b32.xlu0 %v2571_v41, %s2308_s20 }
 0x1e8   : > { %953 = vrot.lane.b32.xlu1 %v2565_v40, %s2308_s20  ;;  %955 = vrot.lane.b32.xlu0 %v2573_v42, %s2308_s20 }
 0x1ec   : > { %982 = vrot.lane.b32.xlu1 %v974_v17, %s2309_s10  ;;  %984 = vrot.lane.b32.xlu0 %v975_v18, %s2309_s10  ;;  %v711_v17 = vrot.slane %v2702_v1, 1  ;;  %v714_v18 = vrot.slane %v2708_v6, 1 }
 0x1f0   : > { %986 = vrot.lane.b32.xlu1 %v976_v19, %s2309_s10  ;;  %988 = vrot.lane.b32.xlu0 %v977_v20, %s2309_s10  ;;  %s2312_s10 = smov 1   ;;  %v749_v19 = vrot.slane %v2710_v8, 2  ;;  %v750_v20 = vrot.slane %v2712_v9, 2 }
 0x1f4   : > { %1023 = vrot.lane.b32.xlu1 %v1015_v21, %s2310_s26  ;;  %1025 = vrot.lane.b32.xlu0 %v1016_v22, %s2310_s26  ;;  %v748_v21 = vrot.slane %v2702_v1, 2 }
 0x1f8   : > { %1027 = vrot.lane.b32.xlu1 %v1017_v23, %s2310_s26  ;;  %1029 = vrot.lane.b32.xlu0 %v1018_v24, %s2310_s26  ;;  %s2313_s26 = smov 127   ;;  %v751_v24 = vrot.slane %v2708_v6, 2 }
 0x1fc   : > { %1060 = vrot.lane.b32.xlu1 %v1052_v25, %s2311_s27  ;;  %1062 = vrot.lane.b32.xlu0 %v1053_v26, %s2311_s27  ;;  %v1286_v25 = vrot.slane %v2577_v45, 2  ;;  %v1287_v26 = vrot.slane %v2583_v47, 2 }
 0x200   : > { %1064 = vrot.lane.b32.xlu1 %v1054_v27, %s2311_s27  ;;  %1066 = vrot.lane.b32.xlu0 %v1055_v28, %s2311_s27  ;;  %s2314_s27 = smov 121   ;;  %v786_v27 = vrot.slane %v2710_v8, 3  ;;  %v1288_v28 = vrot.slane %v2579_v46, 2 }
 0x204   : > { %1097 = vrot.lane.b32.xlu1 %v1089_v29, %s2312_s10  ;;  %1099 = vrot.lane.b32.xlu0 %v1090_v30, %s2312_s10  ;;  %v1289_v29 = vrot.slane %v2585_v48, 2  ;;  %v787_v30 = vrot.slane %v2712_v9, 3 }
 0x208   : > { %1101 = vrot.lane.b32.xlu1 %v1091_v32, %s2312_s10  ;;  %1103 = vrot.lane.b32.xlu0 %v1092_v33, %s2312_s10  ;;  %s2315_s10 = smov 120   ;;  %v785_v32 = vrot.slane %v2702_v1, 3  ;;  %v788_v33 = vrot.slane %v2708_v6, 3 }
 0x20c   : > { %1154 = vrot.lane.b32.xlu1 %v1146_v34, %s2313_s26  ;;  %1156 = vrot.lane.b32.xlu0 %v1147_v35, %s2313_s26  ;;  %v1322_v34 = vrot.slane %v2577_v45, 3  ;;  %v1323_v35 = vrot.slane %v2583_v47, 3 }
 0x210   : > { %1158 = vrot.lane.b32.xlu1 %v1148_v37, %s2313_s26  ;;  %1160 = vrot.lane.b32.xlu0 %v1149_v38, %s2313_s26  ;;  %s2316_s26 = smov 119   ;;  %v823_v38 = vrot.slane %v2710_v8, 4 }
 0x214   : > { %1191 = vrot.lane.b32.xlu1 %v1183_v49, %s2314_s27  ;;  %1193 = vrot.lane.b32.xlu0 %v1184_v50, %s2314_s27  ;;  %v1324_v49 = vrot.slane %v2579_v46, 3 }
 0x216   : > { %v2685_v51 = vpop.permute.xlu1 %663  ;;  %v2687_v52 = vpop.permute.xlu0 %659 }
 0x218   : > { %1195 = vrot.lane.b32.xlu1 %v1185_v53, %s2314_s27  ;;  %1197 = vrot.lane.b32.xlu0 %v1186_v54, %s2314_s27 }
 0x21a   : > { %v2691_v55 = vpop.permute.xlu0 %665  ;;  %v662_v56 = vpop.permute.xlu1 %661 }
 0x21b   : > { %v671_v50 = vsel %vm669_vm5, %v662_v56, %v2685_v51  ;;  %v672_v53 = vsel %vm669_vm5, %v2687_v52, %v662_v56  ;;  %v670_v56 = vsel %vm669_vm5, %v2685_v51, %v2691_v55  ;;  %v673_v3 = vsel %vm669_vm5, %v2691_v55, %v2687_v52 }
 0x21c   : > { %1220 = vrot.lane.b32.xlu1 %v2577_v45, %s2315_s10  ;;  %1222 = vrot.lane.b32.xlu0 %v2583_v47, %s2315_s10  ;;  %v675_v7 = vmul.f32 %v672_v53, %v2710_v8  ;;  %v676_v59 = vmul.f32 %v671_v50, %v2712_v9 }
 0x21e   : > { %v695_v57 = vpop.permute.xlu1 %694  ;;  %v697_v58 = vpop.permute.xlu0 %696 }
 0x21f   : > { %v705_v37 = vsel %vm702_vm6, %v695_v57, %v697_v58 }
 0x220   : > { %1224 = vrot.lane.b32.xlu1 %v2579_v46, %s2315_s10  ;;  %1226 = vrot.lane.b32.xlu0 %v2585_v48, %s2315_s10  ;;  %s3331_s10 = scalar_select %p411_p10, %s2406_s6, 1 }
 0x222   : > { %v699_v60 = vpop.permute.xlu1 %698  ;;  %v701_v61 = vpop.permute.xlu0 %700 }
 0x224   : > { %1253 = vrot.lane.b32.xlu1 %v1245_v62, %s2316_s26  ;;  %1255 = vrot.lane.b32.xlu0 %v1246_v0, %s2316_s26  ;;  %v1325_v0 = vrot.slane %v2585_v48, 3 }
 0x226   : > { %v2704_v2 = vpop.permute.xlu1 %735  ;;  %v738_v4 = vpop.permute.xlu0 %737 }
 0x228   : > { %1257 = vrot.lane.b32.xlu1 %v1247_v5, %s2316_s26  ;;  %1259 = vrot.lane.b32.xlu0 %v1248_v10, %s2316_s26  ;;  %v704_v10 = vsel %vm702_vm6, %v697_v58, %v699_v60  ;;  %v720_v58 = vmul.f32 %v712_v12, %v705_v37  ;;  %s2060_s26 = sshll.u32 %s3331_s10, 2 }
 0x229   : > { %v721_v36 = vmul.f32 %v713_v13, %v704_v10 }
 0x22a   : > { %v740_v22 = vpop.permute.xlu1 %739  ;;  %v742_v23 = vpop.permute.xlu0 %741 }
 0x22b   : > { %v745_v5 = vsel %vm743_vm7, %v738_v4, %v740_v22  ;;  %v744_v37 = vsel %vm743_vm7, %v740_v22, %v742_v23  ;;  %v825_v22 = vrot.slane %v2708_v6, 4 }
 0x22c   : > { %1294 = vrot.lane.b32.xlu1 %v1286_v25, %s2300_s18  ;;  %1296 = vrot.lane.b32.xlu0 %v1287_v26, %s2300_s18  ;;  %v706_v25 = vsel %vm702_vm6, %v701_v61, %v695_v57  ;;  %v746_v26 = vsel %vm743_vm7, %v2704_v2, %v738_v4  ;;  %v703_v57 = vsel %vm702_vm6, %v699_v60, %v701_v61 }
 0x22d   : > { %v719_v52 = vmul.f32 %v711_v17, %v706_v25  ;;  %v757_v55 = vmul.f32 %v749_v19, %v746_v26  ;;  %v747_v60 = vsel %vm743_vm7, %v742_v23, %v2704_v2  ;;  %v758_v13 = vmul.f32 %v750_v20, %v745_v5 }
 0x22e   : > { %v773_v54 = vpop.permute.xlu1 %772  ;;  %v775_v62 = vpop.permute.xlu0 %774  ;;  %v674_v2 = vmul.f32 %v673_v3, %v2702_v1  ;;  %v756_v53 = vmul.f32 %v748_v21, %v747_v60  ;;  %v725_v23 = vadd.f32 %v721_v36, %v676_v59  ;;  %v759_v10 = vmul.f32 %v751_v24, %v744_v37 }
 0x22f   : > { %v783_v51 = vsel %vm780_vm8, %v773_v54, %v775_v62  ;;  %v1358_v36 = vrot.slane %v2577_v45, 4  ;;  %v1359_v59 = vrot.slane %v2583_v47, 4 }
 0x230   : > { %1298 = vrot.lane.b32.xlu1 %v1288_v28, %s2300_s18  ;;  %1300 = vrot.lane.b32.xlu0 %v1289_v29, %s2300_s18  ;;  %v722_v28 = vmul.f32 %v714_v18, %v703_v57  ;;  %v724_v29 = vadd.f32 %v720_v58, %v675_v7  ;;  %v794_v17 = vmul.f32 %v786_v27, %v783_v51  ;;  %v860_v51 = vrot.slane %v2710_v8, 5 }
 0x231   : > { %v677_v18 = vmul.f32 %v670_v56, %v2708_v6  ;;  %v723_v5 = vadd.f32 %v719_v52, %v674_v2  ;;  %v762_v3 = vadd.f32 %v758_v13, %v725_v23  ;;  %v1361_v2 = vrot.slane %v2585_v48, 4 }
 0x232   : > { %v777_v61 = vpop.permute.xlu1 %776  ;;  %v779_v12 = vpop.permute.xlu0 %778  ;;  %v862_v23 = vrot.slane %v2708_v6, 5 }
 0x233   : > { %v782_v4 = vsel %vm780_vm8, %v775_v62, %v777_v61  ;;  %v781_v50 = vsel %vm780_vm8, %v777_v61, %v779_v12  ;;  %v784_v19 = vsel %vm780_vm8, %v779_v12, %v773_v54  ;;  %v761_v62 = vadd.f32 %v757_v55, %v724_v29 }
 0x234   : > { %1330 = vrot.lane.b32.xlu1 %v1322_v34, %s2301_s13  ;;  %1332 = vrot.lane.b32.xlu0 %v1323_v35, %s2301_s13  ;;  %v795_v7 = vmul.f32 %v787_v30, %v782_v4  ;;  %v726_v25 = vadd.f32 %v722_v28, %v677_v18  ;;  %v793_v54 = vmul.f32 %v785_v32, %v784_v19  ;;  %v3462_v55 = vrot.slane %v2712_v9, 4 }
 0x235   : > { %v798_v26 = vadd.f32 %v794_v17, %v761_v62  ;;  %v796_v56 = vmul.f32 %v788_v33, %v781_v50  ;;  %v760_v35 = vadd.f32 %v756_v53, %v723_v5  ;;  %v3463_v61 = vrot.slane %v2702_v1, 4 }
 0x236   : > { %v810_v20 = vpop.permute.xlu1 %809  ;;  %v812_v27 = vpop.permute.xlu0 %811  ;;  %v763_v24 = vadd.f32 %v759_v10, %v726_v25  ;;  %v799_v30 = vadd.f32 %v795_v7, %v762_v3  ;;  %v1360_v17 = vrot.slane %v2579_v46, 4  ;;  %v861_v53 = vrot.slane %v2712_v9, 5 }
 0x237   : > { %v820_v34 = vsel %vm817_vm9, %v810_v20, %v812_v27  ;;  %v797_v33 = vadd.f32 %v793_v54, %v760_v35 }
 0x238   : > { %v831_v21 = vmul.f32 %v823_v38, %v820_v34  ;;  %1334 = vrot.lane.b32.xlu1 %v1324_v49, %s2301_s13  ;;  %1336 = vrot.lane.b32.xlu0 %v1325_v0, %s2301_s13  ;;  %v800_v52 = vadd.f32 %v796_v56, %v763_v24  ;;  %v897_v56 = vrot.slane %v2710_v8, 6 }
 0x23a   : > { %v835_v32 = vadd.f32 %v831_v21, %v798_v26  ;;  %v814_v58 = vpop.permute.xlu1 %813  ;;  %v816_v57 = vpop.permute.xlu0 %815 }
 0x23b   : > { %v819_v38 = vsel %vm817_vm9, %v812_v27, %v814_v58  ;;  %v818_v49 = vsel %vm817_vm9, %v814_v58, %v816_v57  ;;  %v821_v0 = vsel %vm817_vm9, %v816_v57, %v810_v20  ;;  %v1394_v20 = vrot.slane %v2577_v45, 5 }
 0x23c   : > { %v832_v60 = vmul.f32 %v3462_v55, %v819_v38  ;;  %v830_v12 = vmul.f32 %v3463_v61, %v821_v0  ;;  %v833_v28 = vmul.f32 %v825_v22, %v818_v49  ;;  %1366 = vrot.lane.b32.xlu1 %v1358_v36, %s2302_s12  ;;  %1368 = vrot.lane.b32.xlu0 %v1359_v59, %s2302_s12  ;;  %v859_v22 = vrot.slane %v2702_v1, 5 }
 0x23d   : > { %v1395_v27 = vrot.slane %v2583_v47, 5  ;;  %v1397_v58 = vrot.slane %v2585_v48, 5  ;;  %v899_v38 = vrot.slane %v2708_v6, 6  ;;  %v1430_v55 = vrot.slane %v2577_v45, 6 }
 0x23e   : > { %v836_v37 = vadd.f32 %v832_v60, %v799_v30  ;;  %v834_v4 = vadd.f32 %v830_v12, %v797_v33  ;;  %v837_v50 = vadd.f32 %v833_v28, %v800_v52  ;;  %v847_v29 = vpop.permute.xlu1 %846  ;;  %v849_v13 = vpop.permute.xlu0 %848  ;;  %v1396_v30 = vrot.slane %v2579_v46, 5 }
 0x23f   : > { %v857_v19 = vsel %vm854_vm10, %v847_v29, %v849_v13  ;;  %v896_v33 = vrot.slane %v2702_v1, 6  ;;  %v1431_v60 = vrot.slane %v2583_v47, 6 }
 0x240   : > { %v868_v18 = vmul.f32 %v860_v51, %v857_v19  ;;  %1370 = vrot.lane.b32.xlu1 %v1360_v17, %s2302_s12  ;;  %1372 = vrot.lane.b32.xlu0 %v1361_v2, %s2302_s12  ;;  %v898_v51 = vrot.slane %v2712_v9, 6  ;;  %s414_s12 = scalar_lea.vmem %s3435_s0, %s2060_s26 }
 0x242   : > { %v872_v62 = vadd.f32 %v868_v18, %v835_v32  ;;  %v851_v10 = vpop.permute.xlu1 %850  ;;  %v853_v7 = vpop.permute.xlu0 %852 }
 0x243   : > { %v856_v5 = vsel %vm854_vm10, %v849_v13, %v851_v10  ;;  %v855_v25 = vsel %vm854_vm10, %v851_v10, %v853_v7  ;;  %v858_v54 = vsel %vm854_vm10, %v853_v7, %v847_v29  ;;  %v934_v29 = vrot.slane %v2710_v8, 7 }
 0x244   : > { %v869_v34 = vmul.f32 %v861_v53, %v856_v5  ;;  %v867_v3 = vmul.f32 %v859_v22, %v858_v54  ;;  %v870_v26 = vmul.f32 %v862_v23, %v855_v25  ;;  %1402 = vrot.lane.b32.xlu1 %v1394_v20, %s2303_s17  ;;  %1404 = vrot.lane.b32.xlu0 %v1395_v27, %s2303_s17  ;;  %v1432_v53 = vrot.slane %v2579_v46, 6 }
 0x245   : > { %v1433_v23 = vrot.slane %v2585_v48, 6  ;;  %v935_v10 = vrot.slane %v2712_v9, 7  ;;  %v933_v8 = vrot.slane %v2702_v1, 7  ;;  %v936_v7 = vrot.slane %v2708_v6, 7 }
 0x246   : > { %v873_v21 = vadd.f32 %v869_v34, %v836_v37  ;;  %v871_v35 = vadd.f32 %v867_v3, %v834_v4  ;;  %v874_v36 = vadd.f32 %v870_v26, %v837_v50  ;;  %v884_v59 = vpop.permute.xlu1 %883  ;;  %v886_v24 = vpop.permute.xlu0 %885  ;;  %v1466_v25 = vrot.slane %v2577_v45, 7 }
 0x247   : > { %v894_v32 = vsel %vm891_vm11, %v884_v59, %v886_v24  ;;  %v1467_v1 = vrot.slane %v2583_v47, 7 }
 0x248   : > { %v905_v57 = vmul.f32 %v897_v56, %v894_v32  ;;  %1406 = vrot.lane.b32.xlu1 %v1396_v30, %s2303_s17  ;;  %1408 = vrot.lane.b32.xlu0 %v1397_v58, %s2303_s17  ;;  %v1469_v30 = vrot.slane %v2585_v48, 7 }
 0x24a   : > { %v909_v49 = vadd.f32 %v905_v57, %v872_v62  ;;  %v888_v0 = vpop.permute.xlu1 %887  ;;  %v890_v52 = vpop.permute.xlu0 %889 }
 0x24b   : > { %v893_v61 = vsel %vm891_vm11, %v886_v24, %v888_v0  ;;  %v892_v12 = vsel %vm891_vm11, %v888_v0, %v890_v52  ;;  %v895_v28 = vsel %vm891_vm11, %v890_v52, %v884_v59  ;;  %v1468_v59 = vrot.slane %v2579_v46, 7  ;;  %v2876_v24 = vld [vmem:[#allocation8 + $0x28] sm:$0xff] }
 0x24c   : > { %v906_v37 = vmul.f32 %v898_v51, %v893_v61  ;;  %v904_v4 = vmul.f32 %v896_v33, %v895_v28  ;;  %v907_v50 = vmul.f32 %v899_v38, %v892_v12  ;;  %1438 = vrot.lane.b32.xlu1 %v1430_v55, %s2304_s14  ;;  %1440 = vrot.lane.b32.xlu0 %v1431_v60, %s2304_s14  ;;  %v2884_v33 = vld [vmem:[#allocation8 + $0x30] sm:$0xff]  ;;  %v2888_v38 = vld [vmem:[#allocation8 + $0x20] sm:$0xff]  ;;  %v1000_v61 = vrot.slane %v2876_v24, 1 }
 0x24e   : > { %v910_v13 = vadd.f32 %v906_v37, %v873_v21  ;;  %v908_v17 = vadd.f32 %v904_v4, %v871_v35  ;;  %v911_v19 = vadd.f32 %v907_v50, %v874_v36  ;;  %v921_v2 = vpop.permute.xlu1 %920  ;;  %v923_v18 = vpop.permute.xlu0 %922 }
 0x24f   : > { %v931_v22 = vsel %vm928_vm12, %v921_v2, %v923_v18 }
 0x250   : > { %v942_v62 = vmul.f32 %v934_v29, %v931_v22  ;;  %1442 = vrot.lane.b32.xlu1 %v1432_v53, %s2304_s14  ;;  %1444 = vrot.lane.b32.xlu0 %v1433_v23, %s2304_s14  ;;  %v1527_v53 = vrot.slane %v2639_v14, 1 }
 0x252   : > { %v946_v20 = vadd.f32 %v942_v62, %v909_v49  ;;  %v925_v27 = vpop.permute.xlu1 %924  ;;  %v927_v5 = vpop.permute.xlu0 %926  ;;  %v2890_v49 = vld [vmem:[#allocation8 + $0x38] sm:$0xff] }
 0x253   : > { %v930_v54 = vsel %vm928_vm12, %v923_v18, %v925_v27  ;;  %v929_v34 = vsel %vm928_vm12, %v925_v27, %v927_v5  ;;  %v932_v9 = vsel %vm928_vm12, %v927_v5, %v921_v2  ;;  %v1002_v2 = vrot.slane %v2890_v49, 1 }
 0x254   : > { %v943_v3 = vmul.f32 %v935_v10, %v930_v54  ;;  %v941_v6 = vmul.f32 %v933_v8, %v932_v9  ;;  %v944_v26 = vmul.f32 %v936_v7, %v929_v34  ;;  %1474 = vrot.lane.b32.xlu1 %v1466_v25, %s2305_s16  ;;  %1476 = vrot.lane.b32.xlu0 %v1467_v1, %s2305_s16  ;;  %v1526_v18 = vrot.slane %v2633_v11, 1 }
 0x255   : > { %v1037_v25 = vrot.slane %v2876_v24, 2  ;;  %v1529_v54 = vrot.slane %v2643_v16, 1 }
 0x256   : > { %v947_v45 = vadd.f32 %v943_v3, %v910_v13  ;;  %v945_v56 = vadd.f32 %v941_v6, %v908_v17  ;;  %v948_v21 = vadd.f32 %v944_v26, %v911_v19  ;;  %v950_v35 = vpop.permute.xlu1 %949  ;;  %v952_v36 = vpop.permute.xlu0 %951  ;;  %v1001_v17 = vrot.slane %v2884_v33, 1 }
 0x257   : > { %v960_v47 = vsel %vm957_vm13, %v950_v35, %v952_v36  ;;  %v999_v19 = vrot.slane %v2888_v38, 1  ;;  %v1528_v26 = vrot.slane %v2641_v15, 1 }
 0x258   : > { %v963_v32 = vmul.f32 %v960_v47, %v2876_v24  ;;  %1478 = vrot.lane.b32.xlu1 %v1468_v59, %s2305_s16  ;;  %1480 = vrot.lane.b32.xlu0 %v1469_v30, %s2305_s16  ;;  %v1566_v59 = vrot.slane %v2633_v11, 2  ;;  %v1567_v47 = vrot.slane %v2639_v14, 2  ;;  %s408_s16 = sand.u32 1, %s2283_s22  }
 0x259   : > { %s1954_s13 = scalar_lea.sflag [#allocation6], %s408_s16 }
 0x25a   : > { %v967_v58 = vadd.f32 %v963_v32, %v946_v20  ;;  %v954_v57 = vpop.permute.xlu1 %953  ;;  %v956_v51 = vpop.permute.xlu0 %955 }
 0x25b   : > { %v959_v46 = vsel %vm957_vm13, %v952_v36, %v954_v57  ;;  %v958_v48 = vsel %vm957_vm13, %v954_v57, %v956_v51  ;;  %v961_v0 = vsel %vm957_vm13, %v956_v51, %v950_v35  ;;  %v1036_v35 = vrot.slane %v2888_v38, 2 }
 0x25c   : > { %v964_v52 = vmul.f32 %v959_v46, %v2884_v33  ;;  %v962_v55 = vmul.f32 %v961_v0, %v2888_v38  ;;  %v965_v60 = vmul.f32 %v958_v48, %v2890_v49  ;;  %1502 = vrot.lane.b32.xlu1 %v2633_v11, %s2306_s19  ;;  %1504 = vrot.lane.b32.xlu0 %v2639_v14, %s2306_s19  ;;  %v1039_v36 = vrot.slane %v2890_v49, 2 }
 0x25d   : > { %v1074_v11 = vrot.slane %v2876_v24, 3  ;;  %v1569_v14 = vrot.slane %v2643_v16, 2 }
 0x25e   : > { %v968_v12 = vadd.f32 %v964_v52, %v947_v45  ;;  %v966_v28 = vadd.f32 %v962_v55, %v945_v56  ;;  %v969_v37 = vadd.f32 %v965_v60, %v948_v21  ;;  %v983_v4 = vpop.permute.xlu1 %982  ;;  %v985_v50 = vpop.permute.xlu0 %984  ;;  %v1038_v21 = vrot.slane %v2884_v33, 2 }
 0x25f   : > { %v993_v29 = vsel %vm990_vm14, %v983_v4, %v985_v50 }
 0x260   : > { %v1008_v13 = vmul.f32 %v1000_v61, %v993_v29  ;;  %1506 = vrot.lane.b32.xlu1 %v2641_v15, %s2306_s19  ;;  %1508 = vrot.lane.b32.xlu0 %v2643_v16, %s2306_s19  ;;  %v1075_v29 = vrot.slane %v2884_v33, 3  ;;  %v1732_v16 = vld [vmem:[%s3443_s8] sm:$0xff]  ;;  %s2059_s19 = sshll.u32 %s408_s16, 2 }
 0x262   : > { %v1012_v22 = vadd.f32 %v1008_v13, %v967_v58  ;;  %v987_v23 = vpop.permute.xlu1 %986  ;;  %v989_v62 = vpop.permute.xlu0 %988  ;;  %v1073_v13 = vrot.slane %v2888_v38, 3 }
 0x263   : > { %v992_v10 = vsel %vm990_vm14, %v985_v50, %v987_v23  ;;  %v991_v8 = vsel %vm990_vm14, %v987_v23, %v989_v62  ;;  %v994_v7 = vsel %vm990_vm14, %v989_v62, %v983_v4  ;;  %vm1261_vm14 = vcmp.lt.s32.totalorder %v2699_v63, 119 }
 0x264   : > { %v1009_v20 = vmul.f32 %v1001_v17, %v992_v10  ;;  %v1007_v27 = vmul.f32 %v999_v19, %v994_v7  ;;  %v1010_v5 = vmul.f32 %v1002_v2, %v991_v8  ;;  %1536 = vrot.lane.b32.xlu1 %v1527_v53, %s2307_s15  ;;  %1534 = vrot.lane.b32.xlu0 %v1526_v18, %s2307_s15  ;;  %v1076_v17 = vrot.slane %v2890_v49, 3  ;;  %v2177_v7 = vld [vmem:[%s3442_s7 + $0x8] sm:$0xff] }
 0x265   : > { %v1111_v8 = vrot.slane %v2876_v24, 4 }
 0x266   : > { %v1013_v34 = vadd.f32 %v1009_v20, %v968_v12  ;;  %v1011_v9 = vadd.f32 %v1007_v27, %v966_v28  ;;  %v1014_v1 = vadd.f32 %v1010_v5, %v969_v37  ;;  %v1024_v3 = vpop.permute.xlu1 %1023  ;;  %v1026_v6 = vpop.permute.xlu0 %1025  ;;  %v1568_v37 = vrot.slane %v2641_v15, 2  ;;  %v1733_v20 = vld [vmem:[%s3443_s8 + $0x8] sm:$0xff] }
 0x267   : > { %v1034_v45 = vsel %vm1031_vm15, %v1024_v3, %v1026_v6 }
 0x268   : > { %v1045_v56 = vmul.f32 %v1037_v25, %v1034_v45  ;;  %1540 = vrot.lane.b32.xlu1 %v1529_v54, %s2307_s15  ;;  %1538 = vrot.lane.b32.xlu0 %v1528_v26, %s2307_s15  ;;  %v1112_v26 = vrot.slane %v2884_v33, 4  ;;  %v1110_v45 = vrot.slane %v2888_v38, 4  ;;  %s2077_s15 = sshll.u32 %s2406_s6, 6  ;;  %s2318_s6 = smov [#allocation9]  }
 0x269   : > { %s3393_s18 = scalar_lea.hbm %s3445_s11, %s2077_s15  ;;  %s2225_s17 = sshll.u32 %s2318_s6, 4  ;;  %s2226_s17 = int_to_ptr.vmem [resolvable:$false] %s2225_s17 }
 0x26a   : > { %v1049_v30 = vadd.f32 %v1045_v56, %v1012_v22  ;;  %v1028_v32 = vpop.permute.xlu1 %1027  ;;  %v1030_v58 = vpop.permute.xlu0 %1029  ;;  %v1113_v56 = vrot.slane %v2890_v49, 4  ;;  %s2227_s14 = scalar_lea.vmem %s2226_s17, 128 }
 0x26b   : > { %v1033_v57 = vsel %vm1031_vm15, %v1026_v6, %v1028_v32  ;;  %v1032_v51 = vsel %vm1031_vm15, %v1028_v32, %v1030_v58  ;;  %v1035_v46 = vsel %vm1031_vm15, %v1030_v58, %v1024_v3  ;;  %v1631_v3 = vld [vmem:[%s3442_s7 + $0x10] sm:$0xff]  ;;  %v1129_v32 = vmul.f32 %v2573_v42, %v2890_v49 }
 0x26c   : > { %v1046_v48 = vmul.f32 %v1038_v21, %v1033_v57  ;;  %v1044_v0 = vmul.f32 %v1036_v35, %v1035_v46  ;;  %v1047_v52 = vmul.f32 %v1039_v36, %v1032_v51  ;;  %1576 = vrot.lane.b32.xlu1 %v1567_v47, %s2308_s20  ;;  %1574 = vrot.lane.b32.xlu0 %v1566_v59, %s2308_s20  ;;  %v3464_v21 = vmov 1   ;;  %v1734_v42 = vld [vmem:[%s3443_s8 + $0x10] sm:$0xff] }
 0x26d   : > { %v1128_v35 = vmul.f32 %v2565_v40, %v2884_v33  ;;  %v1167_v40 = vrot.slane %v2888_v38, 6 }
 0x26e   : > { %v1050_v55 = vadd.f32 %v1046_v48, %v1013_v34  ;;  %v1048_v60 = vadd.f32 %v1044_v0, %v1011_v9  ;;  %v1051_v61 = vadd.f32 %v1047_v52, %v1014_v1  ;;  %v1061_v12 = vpop.permute.xlu1 %1060  ;;  %v1063_v28 = vpop.permute.xlu0 %1062  ;;  %v1127_v9 = vmul.f32 %v2571_v41, %v2876_v24 }
 0x26f   : > { %v1071_v4 = vsel %vm1068_vm0, %v1061_v12, %v1063_v28  ;;  %v1126_v41 = vmul.f32 %v2563_v39, %v2888_v38 }
 0x270   : > { %v1082_v50 = vmul.f32 %v1074_v11, %v1071_v4  ;;  %1580 = vrot.lane.b32.xlu1 %v1569_v14, %s2308_s20  ;;  %1578 = vrot.lane.b32.xlu0 %v1568_v37, %s2308_s20  ;;  %v1136_v11 = vrot.slane %v1128_v35, 5  ;;  %v3465_v37 = vmov 0   ;;  %s410_s20 = scalar_lea.vmem [#allocation9], %s2059_s19 }
 0x271   : > { %v1134_v52 = vrot.slane %v1126_v41, 5  ;;  %s1968_s27 = sshll.u32 %s410_s20, 4  ;;  %s3395_s27 = int_to_ptr.vmem [resolvable:$true] %s1968_s27 }
 0x272   : > { %v1086_v19 = vadd.f32 %v1082_v50, %v1049_v30  ;;  %v1065_v15 = vpop.permute.xlu1 %1064  ;;  %v1067_v2 = vpop.permute.xlu0 %1066  ;;  %v1135_v30 = vrot.slane %v1127_v9, 5  ;;  %v1168_v50 = vrot.slane %v2876_v24, 6  ;;  %p2228_p4 = scmp.lt.s32.totalorder %s3395_s27, %s2226_s17 }
 0x273   : > { %v1070_v18 = vsel %vm1068_vm0, %v1063_v28, %v1065_v15  ;;  %v1069_v53 = vsel %vm1068_vm0, %v1065_v15, %v1067_v2  ;;  %v1072_v22 = vsel %vm1068_vm0, %v1067_v2, %v1061_v12  ;;  %v1137_v28 = vrot.slane %v1129_v32, 5 }
 0x274   : > { %v1083_v23 = vmul.f32 %v1075_v29, %v1070_v18  ;;  %v1081_v62 = vmul.f32 %v1073_v13, %v1072_v22  ;;  %v1084_v10 = vmul.f32 %v1076_v17, %v1069_v53  ;;  %1737 = vperm.xlu1 %2173, %v1732_v16   ;;  %1680 = vperm.xlu0 %2174, %v2177_v7   ;;  %v1169_v29 = vrot.slane %v2884_v33, 6 }
 0x275   : > { %v1170_v13 = vrot.slane %v2890_v49, 6 }
 0x276   : > { %v1087_v27 = vadd.f32 %v1083_v23, %v1050_v55  ;;  %v1085_v5 = vadd.f32 %v1081_v62, %v1048_v60  ;;  %v1088_v25 = vadd.f32 %v1084_v10, %v1051_v61  ;;  %v1098_v54 = vpop.permute.xlu1 %1097  ;;  %v1100_v34 = vpop.permute.xlu0 %1099 }
 0x277   : > { %v1108_v1 = vsel %vm1105_vm1, %v1098_v54, %v1100_v34 }
 0x278   : > { %v1119_v6 = vmul.f32 %v1111_v8, %v1108_v1  ;;  %1742 = vperm.xlu1 %2173, %v1733_v20   ;;  %2175 = vset.pattern.permute.xlu0 %v3464_v21  ;;  %v1204_v20 = vrot.slane %v2888_v38, 7 }
 0x279   : > { %1644 = vperm.xlu0 %2175, %v1631_v3  }
 0x27a   : > { %v1123_v36 = vadd.f32 %v1119_v6, %v1086_v19  ;;  %v1102_v59 = vpop.permute.xlu1 %1101  ;;  %v1104_v47 = vpop.permute.xlu0 %1103  ;;  %v1205_v6 = vrot.slane %v2876_v24, 7 }
 0x27b   : > { %v1107_v58 = vsel %vm1105_vm1, %v1100_v34, %v1102_v59  ;;  %v1106_v57 = vsel %vm1105_vm1, %v1102_v59, %v1104_v47  ;;  %v1109_v39 = vsel %vm1105_vm1, %v1104_v47, %v1098_v54 }
 0x27c   : > { %v1120_v51 = vmul.f32 %v1112_v26, %v1107_v58  ;;  %v1118_v46 = vmul.f32 %v1110_v45, %v1109_v39  ;;  %v1121_v48 = vmul.f32 %v1113_v56, %v1106_v57  ;;  %1684 = vperm.xlu1 %2173, %v1631_v3   ;;  %v1143_v0 = vadd.f32 %v1135_v30, %v1123_v36  ;;  %v3029_v58 = vld [vmem:[#allocation8 + $0x40] sm:$0xff] }
 0x27d   : > { %2176 = vset.pattern.permute.xlu0 %v3465_v37  ;;  %v1206_v26 = vrot.slane %v2884_v33, 7  ;;  %v1207_v45 = vrot.slane %v2890_v49, 7 }
 0x27e   : > { %v1124_v14 = vadd.f32 %v1120_v51, %v1087_v27  ;;  %v1122_v55 = vadd.f32 %v1118_v46, %v1085_v5  ;;  %v1125_v60 = vadd.f32 %v1121_v48, %v1088_v25  ;;  %v1155_v61 = vpop.permute.xlu1 %1154  ;;  %v1157_v12 = vpop.permute.xlu0 %1156  ;;  %v1763_v27 = vld [vmem:[#allocation3] sm:$0x1]  ;;  %v3034_v51 = vld [vmem:[#allocation8 + $0x48] sm:$0xff] }
 0x27f   : > { %v1165_v4 = vsel %vm1162_vm2, %v1155_v61, %v1157_v12  ;;  %1766 = vperm.xlu0 %2176, %v1763_v27   ;;  %v3036_v48 = vld [vmem:[#allocation8 + $0x58] sm:$0xff] }
 0x280   : > { %v1142_v17 = vadd.f32 %v1134_v52, %v1122_v55  ;;  %v1175_v16 = vmul.f32 %v1167_v40, %v1165_v4  ;;  %1747 = vperm.xlu1 %2173, %v1734_v42   ;;  %v1144_v19 = vadd.f32 %v1136_v11, %v1124_v14  ;;  %v1145_v15 = vadd.f32 %v1137_v28, %v1125_v60 }
 0x282   : > { %v1179_v2 = vadd.f32 %v1175_v16, %v1142_v17  ;;  %v1159_v18 = vpop.permute.xlu1 %1158  ;;  %v1161_v53 = vpop.permute.xlu0 %1160 }
 0x283   : > { %v1164_v22 = vsel %vm1162_vm2, %v1157_v12, %v1159_v18  ;;  %v1163_v23 = vsel %vm1162_vm2, %v1159_v18, %v1161_v53  ;;  %v1166_v62 = vsel %vm1162_vm2, %v1161_v53, %v1155_v61 }
 0x284   : > { %v1176_v10 = vmul.f32 %v1168_v50, %v1164_v22  ;;  %v1177_v8 = vmul.f32 %v1169_v29, %v1163_v23  ;;  %v1178_v7 = vmul.f32 %v1170_v13, %v1166_v62 }
 0x286   : > { %v1180_v5 = vadd.f32 %v1176_v10, %v1143_v0  ;;  %v1181_v25 = vadd.f32 %v1177_v8, %v1144_v19  ;;  %v1182_v54 = vadd.f32 %v1178_v7, %v1145_v15  ;;  %v1192_v34 = vpop.permute.xlu1 %1191  ;;  %v1194_v9 = vpop.permute.xlu0 %1193  ;;  %v3466_v8 = vlaneseq }
 0x287   : > { %v1202_v1 = vsel %vm1199_vm3, %v1192_v34, %v1194_v9 }
 0x288   : > { %v1212_v3 = vmul.f32 %v1204_v20, %v1202_v1  ;;  %v3081_v7 = vshrl.u32 %v3466_v8, 7  ;;  %v1273_v1 = vrot.slane %v3036_v48, 1 }
 0x28a   : > { %v1216_v56 = vadd.f32 %v1212_v3, %v1179_v2  ;;  %v1196_v21 = vpop.permute.xlu1 %1195  ;;  %v1198_v38 = vpop.permute.xlu0 %1197 }
 0x28b   : > { %v1201_v41 = vsel %vm1199_vm3, %v1194_v9, %v1196_v21  ;;  %v1200_v35 = vsel %vm1199_vm3, %v1196_v21, %v1198_v38  ;;  %v1203_v36 = vsel %vm1199_vm3, %v1198_v38, %v1192_v34  ;;  %v1271_v34 = vrot.slane %v3034_v51, 1 }
 0x28c   : > { %v1213_v59 = vmul.f32 %v1205_v6, %v1201_v41  ;;  %v1214_v47 = vmul.f32 %v1206_v26, %v1200_v35  ;;  %v1215_v30 = vmul.f32 %v1207_v45, %v1203_v36  ;;  %v1306_v6 = vrot.slane %v3029_v58, 2 }
 0x28d   : > { %v1307_v26 = vrot.slane %v3034_v51, 2  ;;  %v1342_v38 = vrot.slane %v3029_v58, 3  ;;  %v1343_v41 = vrot.slane %v3034_v51, 3 }
 0x28e   : > { %v1217_v24 = vadd.f32 %v1213_v59, %v1180_v5  ;;  %v3027_v33 = vadd.f32 %v1214_v47, %v1181_v25  ;;  %v1219_v49 = vadd.f32 %v1215_v30, %v1182_v54  ;;  %v1221_v32 = vpop.permute.xlu1 %1220  ;;  %v1223_v57 = vpop.permute.xlu0 %1222  ;;  %v3088_v5 = vsub.s32 0, %v3081_v7  ;;  %v3090_v25 = vld [vmem:[#allocation8 + $0x50] sm:$0xff] }
 0x28f   : > { %v1231_v39 = vsel %vm1228_vm4, %v1221_v32, %v1223_v57  ;;  %v1270_v54 = vrot.slane %v3029_v58, 1  ;;  %v1272_v9 = vrot.slane %v3090_v25, 1  ;;  %v1308_v45 = vrot.slane %v3090_v25, 2 }
 0x290   : > { %v1233_v40 = vmul.f32 %v1231_v39, %v3029_v58 }
 0x292   : > { %v1225_v46 = vpop.permute.xlu1 %1224  ;;  %v3038_v0 = vadd.f32 %v1233_v40, %v1216_v56  ;;  %v1227_v42 = vpop.permute.xlu0 %1226  ;;  %v1309_v56 = vrot.slane %v3036_v48, 2 }
 0x293   : > { %v1230_v52 = vsel %vm1228_vm4, %v1223_v57, %v1225_v46  ;;  %v1232_v14 = vsel %vm1228_vm4, %v1227_v42, %v1221_v32 }
 0x294   : > { %v1234_v11 = vmul.f32 %v1230_v52, %v3034_v51  ;;  %v1236_v55 = vmul.f32 %v1232_v14, %v3036_v48  ;;  %v1229_v52 = vsel %vm1228_vm4, %v1225_v46, %v1227_v42  ;;  %v3150_v42 = vld [vmem:[#allocation8 + $0x68] sm:$0x7] }
 0x295   : > { %v1235_v30 = vmul.f32 %v1229_v52, %v3090_v25  ;;  %v1551_v59 = vrot.slane %v3150_v42, 1 }
 0x296   : > { %v3046_v60 = vadd.f32 %v1234_v11, %v1217_v24  ;;  %v3048_v61 = vpop.permute.xlu1 %1253  ;;  %v3050_v12 = vadd.f32 %v1236_v55, %v1219_v49  ;;  %v1256_v28 = vpop.permute.xlu0 %1255  ;;  %v3138_v11 = vld [vmem:[#allocation8 + $0x60] sm:$0x7] }
 0x297   : > { %v1264_v32 = vsel %vm1261_vm14, %v3048_v61, %v1256_v28 }
 0x298   : > { %v1278_v24 = vmul.f32 %v1270_v54, %v1264_v32 }
 0x29a   : > { %v1258_v37 = vpop.permute.xlu1 %1257  ;;  %v1260_v4 = vpop.permute.xlu0 %1259 }
 0x29b   : > { %v1263_v39 = vsel %vm1261_vm14, %v1256_v28, %v1258_v37  ;;  %v1262_v46 = vsel %vm1261_vm14, %v1258_v37, %v1260_v4  ;;  %v1265_v28 = vsel %vm1261_vm14, %v1260_v4, %v3048_v61  ;;  %v3159_v61 = vld [vmem:[#allocation8 + $0x70] sm:$0x7]  ;;  %v3161_v4 = vld [vmem:[#allocation8 + $0x78] sm:$0x7] }
 0x29c   : > { %v1279_v57 = vmul.f32 %v1271_v34, %v1263_v39  ;;  %v1280_v36 = vmul.f32 %v1272_v9, %v1262_v46  ;;  %v1552_v35 = vrot.slane %v3159_v61, 1  ;;  %v1553_v14 = vrot.slane %v3161_v4, 1 }
 0x29d   : > { %v1281_v34 = vmul.f32 %v1273_v1, %v1265_v28  ;;  %v1239_v9 = vadd.f32 %v1235_v30, %v3027_v33 }
 0x29e   : > { %v3052_v50 = vpop.permute.xlu1 %1294  ;;  %v3054_v29 = vpop.permute.xlu0 %1296 }
 0x29f   : > { %v1304_v49 = vsel %vm669_vm5, %v3052_v50, %v3054_v29 }
 0x2a0   : > { %v1314_v32 = vmul.f32 %v1306_v6, %v1304_v49  ;;  %v1587_v6 = vrot.slane %v3150_v42, 2  ;;  %v1282_v49 = vadd.f32 %v1278_v24, %v3038_v0 }
 0x2a2   : > { %v3056_v13 = vpop.permute.xlu1 %1298  ;;  %v3058_v17 = vpop.permute.xlu0 %1300  ;;  %v1318_v24 = vadd.f32 %v1314_v32, %v1282_v49 }
 0x2a3   : > { %v1303_v52 = vsel %vm669_vm5, %v3054_v29, %v3056_v13  ;;  %v1302_v29 = vsel %vm669_vm5, %v3056_v13, %v3058_v17  ;;  %v1305_v39 = vsel %vm669_vm5, %v3058_v17, %v3052_v50  ;;  %v1283_v13 = vadd.f32 %v1279_v57, %v3046_v60 }
 0x2a4   : > { %v1315_v46 = vmul.f32 %v1307_v26, %v1303_v52  ;;  %v1284_v26 = vadd.f32 %v1280_v36, %v1239_v9  ;;  %v1316_v30 = vmul.f32 %v1308_v45, %v1302_v29  ;;  %v1317_v28 = vmul.f32 %v1309_v56, %v1305_v39 }
 0x2a5   : > { %v1285_v60 = vadd.f32 %v1281_v34, %v3050_v12  ;;  %v3467_v56 = vrot.slane %v3090_v25, 3  ;;  %v3469_v29 = vrot.slane %v3029_v58, 4 }
 0x2a6   : > { %v3060_v16 = vpop.permute.xlu1 %1330  ;;  %v3062_v19 = vpop.permute.xlu0 %1332  ;;  %v1319_v57 = vadd.f32 %v1315_v46, %v1283_v13  ;;  %v1320_v34 = vadd.f32 %v1316_v30, %v1284_v26  ;;  %v3470_v46 = vrot.slane %v3034_v51, 4  ;;  %v3471_v13 = vrot.slane %v3090_v25, 4 }
 0x2a7   : > { %v1340_v54 = vsel %vm702_vm6, %v3060_v16, %v3062_v19  ;;  %v1321_v32 = vadd.f32 %v1317_v28, %v1285_v60  ;;  %v3473_v26 = vrot.slane %v3029_v58, 5 }
 0x2aa   : > { %v3064_v15 = vpop.permute.xlu1 %1334  ;;  %v3066_v2 = vpop.permute.xlu0 %1336 }
 0x2ab   : > { %v1339_v50 = vsel %vm702_vm6, %v3062_v19, %v3064_v15  ;;  %v1338_v33 = vsel %vm702_vm6, %v3064_v15, %v3066_v2  ;;  %v1341_v0 = vsel %vm702_vm6, %v3066_v2, %v3060_v16  ;;  %v1350_v19 = vmul.f32 %v1342_v38, %v1340_v54 }
 0x2ac   : > { %v1351_v45 = vmul.f32 %v1343_v41, %v1339_v50  ;;  %v1352_v36 = vmul.f32 %v3467_v56, %v1338_v33  ;;  %v3468_v2 = vrot.slane %v3036_v48, 3  ;;  %v3472_v33 = vrot.slane %v3036_v48, 4 }
 0x2ad   : > { %v1354_v9 = vadd.f32 %v1350_v19, %v1318_v24  ;;  %v3475_v56 = vrot.slane %v3090_v25, 5 }
 0x2ae   : > { %v3068_v18 = vpop.permute.xlu1 %1366  ;;  %v3070_v53 = vpop.permute.xlu0 %1368  ;;  %v1353_v38 = vmul.f32 %v3468_v2, %v1341_v0  ;;  %v1355_v0 = vadd.f32 %v1351_v45, %v1319_v57  ;;  %v1356_v60 = vadd.f32 %v1352_v36, %v1320_v34  ;;  %v3476_v2 = vrot.slane %v3036_v48, 5 }
 0x2af   : > { %v1376_v15 = vsel %vm743_vm7, %v3068_v18, %v3070_v53  ;;  %v3477_v57 = vrot.slane %v3029_v58, 6  ;;  %v1588_v36 = vrot.slane %v3159_v61, 2 }
 0x2b0   : > { %v1386_v39 = vmul.f32 %v3469_v29, %v1376_v15  ;;  %v1357_v24 = vadd.f32 %v1353_v38, %v1321_v32  ;;  %v1589_v38 = vrot.slane %v3161_v4, 2 }
 0x2b2   : > { %v3072_v22 = vpop.permute.xlu1 %1370  ;;  %v3074_v23 = vpop.permute.xlu0 %1372  ;;  %v1390_v15 = vadd.f32 %v1386_v39, %v1354_v9 }
 0x2b3   : > { %v1375_v12 = vsel %vm743_vm7, %v3070_v53, %v3072_v22  ;;  %v1374_v52 = vsel %vm743_vm7, %v3072_v22, %v3074_v23  ;;  %v1377_v41 = vsel %vm743_vm7, %v3074_v23, %v3068_v18 }
 0x2b4   : > { %v1387_v18 = vmul.f32 %v3470_v46, %v1375_v12  ;;  %v1388_v50 = vmul.f32 %v3471_v13, %v1374_v52 }
 0x2b6   : > { %v3076_v62 = vpop.permute.xlu1 %1402  ;;  %v3078_v10 = vpop.permute.xlu0 %1404  ;;  %v1392_v34 = vadd.f32 %v1388_v50, %v1356_v60 }
 0x2b7   : > { %v1412_v54 = vsel %vm780_vm8, %v3076_v62, %v3078_v10 }
 0x2b8   : > { %v1422_v30 = vmul.f32 %v3473_v26, %v1412_v54  ;;  %v1391_v54 = vadd.f32 %v1387_v18, %v1355_v0  ;;  %v3478_v18 = vrot.slane %v3036_v48, 6  ;;  %v3479_v26 = vrot.slane %v3029_v58, 7 }
 0x2b9   : > { %v3481_v0 = vrot.slane %v3090_v25, 6 }
 0x2ba   : > { %v3083_v20 = vpop.permute.xlu1 %1406  ;;  %v3085_v27 = vpop.permute.xlu0 %1408  ;;  %v1426_v29 = vadd.f32 %v1422_v30, %v1390_v15 }
 0x2bb   : > { %v1411_v22 = vsel %vm780_vm8, %v3078_v10, %v3083_v20  ;;  %v1410_v23 = vsel %vm780_vm8, %v3083_v20, %v3085_v27  ;;  %v1413_v49 = vsel %vm780_vm8, %v3085_v27, %v3076_v62  ;;  %v1389_v10 = vmul.f32 %v3472_v33, %v1377_v41 }
 0x2bc   : > { %v3474_v62 = vrot.slane %v3034_v51, 5  ;;  %v1424_v12 = vmul.f32 %v3475_v56, %v1410_v23  ;;  %v1425_v52 = vmul.f32 %v3476_v2, %v1413_v49  ;;  %v3484_v2 = vrot.slane %v3090_v25, 7 }
 0x2bd   : > { %v1393_v32 = vadd.f32 %v1389_v10, %v1357_v24 }
 0x2be   : > { %v3097_v3 = vpop.permute.xlu1 %1438  ;;  %v3103_v21 = vpop.permute.xlu0 %1440  ;;  %v1423_v27 = vmul.f32 %v3474_v62, %v1411_v22  ;;  %v1428_v13 = vadd.f32 %v1424_v12, %v1392_v34  ;;  %v3483_v12 = vrot.slane %v3034_v51, 7 }
 0x2bf   : > { %v1448_v28 = vsel %vm817_vm9, %v3097_v3, %v3103_v21  ;;  %v1429_v50 = vadd.f32 %v1425_v52, %v1393_v32 }
 0x2c0   : > { %v1458_v45 = vmul.f32 %v3477_v57, %v1448_v28  ;;  %v1427_v9 = vadd.f32 %v1423_v27, %v1391_v54  ;;  %v3480_v28 = vrot.slane %v3034_v51, 6  ;;  %v3482_v27 = vrot.slane %v3036_v48, 7 }
 0x2c2   : > { %v3117_v40 = vpop.permute.xlu1 %1442  ;;  %v3123_v55 = vpop.permute.xlu0 %1444  ;;  %v1462_v10 = vadd.f32 %v1458_v45, %v1426_v29  ;;  %v3485_v45 = vrot.slane %v3138_v11, 1 }
 0x2c3   : > { %v1449_v41 = vsel %vm817_vm9, %v3123_v55, %v3097_v3  ;;  %v1447_v3 = vsel %vm817_vm9, %v3103_v21, %v3117_v40  ;;  %v1446_v46 = vsel %vm817_vm9, %v3117_v40, %v3123_v55  ;;  %vm1773_vm9 = vcmask 195584  }
 0x2c4   : > { %v1461_v23 = vmul.f32 %v3478_v18, %v1449_v41  ;;  %v1460_v60 = vmul.f32 %v3481_v0, %v1446_v46 }
 0x2c6   : > { %v3148_v37 = vpop.permute.xlu1 %1474  ;;  %v3157_v47 = vpop.permute.xlu0 %1476  ;;  %v1464_v32 = vadd.f32 %v1460_v60, %v1428_v13 }
 0x2c7   : > { %v1484_v39 = vsel %vm854_vm10, %v3148_v37, %v3157_v47 }
 0x2c8   : > { %v1494_v30 = vmul.f32 %v3479_v26, %v1484_v39 }
 0x2ca   : > { %v3180_v1 = vpop.permute.xlu1 %1478  ;;  %v3193_v17 = vpop.permute.xlu0 %1480  ;;  %v1498_v54 = vadd.f32 %v1494_v30, %v1462_v10 }
 0x2cb   : > { %v1485_v33 = vsel %vm854_vm10, %v3193_v17, %v3148_v37  ;;  %v1483_v40 = vsel %vm854_vm10, %v3157_v47, %v3180_v1  ;;  %v1482_v55 = vsel %vm854_vm10, %v3180_v1, %v3193_v17  ;;  %v1459_v37 = vmul.f32 %v3480_v28, %v1447_v3 }
 0x2cc   : > { %v1465_v47 = vadd.f32 %v1461_v23, %v1429_v50  ;;  %v1497_v15 = vmul.f32 %v3482_v27, %v1485_v33  ;;  %v1496_v52 = vmul.f32 %v3484_v2, %v1482_v55  ;;  %vm1950_vm10 = vcmp.lt.s32.totalorder %v3466_v8, 512 }
 0x2cd   : > { %v1463_v51 = vadd.f32 %v1459_v37, %v1427_v9 }
 0x2ce   : > { %v1503_v16 = vpop.permute.xlu1 %1502  ;;  %v1505_v53 = vpop.permute.xlu0 %1504  ;;  %v1500_v18 = vadd.f32 %v1496_v52, %v1464_v32 }
 0x2cf   : > { %v1512_v21 = vsel %vm891_vm11, %v1503_v16, %v1505_v53 }
 0x2d0   : > { %v1514_v1 = vmul.f32 %v1512_v21, %v3138_v11  ;;  %v3486_v21 = vrot.slane %v3138_v11, 2 }
 0x2d2   : > { %v1507_v20 = vpop.permute.xlu1 %1506  ;;  %v1509_v19 = vpop.permute.xlu0 %1508  ;;  %v1518_v39 = vadd.f32 %v1514_v1, %v1498_v54  ;;  %v1698_v1 = vsub.s32 2, %v3081_v7 }
 0x2d3   : > { %v1513_v58 = vsel %vm891_vm11, %v1509_v19, %v1503_v16  ;;  %v1511_v17 = vsel %vm891_vm11, %v1505_v53, %v1507_v20  ;;  %v1495_v16 = vmul.f32 %v3483_v12, %v1483_v40  ;;  %v1510_v41 = vsel %vm891_vm11, %v1507_v20, %v1509_v19 }
 0x2d4   : > { %v1517_v57 = vmul.f32 %v1513_v58, %v3161_v4  ;;  %v1515_v25 = vmul.f32 %v1511_v17, %v3150_v42  ;;  %v1501_v19 = vadd.f32 %v1497_v15, %v1465_v47  ;;  %v1516_v3 = vmul.f32 %v1510_v41, %v3159_v61  ;;  %v1628_v17 = vld [vmem:[%s414_s12] sm:$0xf]  ;;  %s2221_s12 = scalar_lea.vmem %s3395_s27, 64 }
 0x2d5   : > { %v1499_v9 = vadd.f32 %v1495_v16, %v1463_v51  ;;  %v1694_v4 = vsub.s32 1, %v3081_v7  ;;  %v1702_v61 = vsub.s32 3, %v3081_v7  ;;  %v1699_v41 = vrot.slane %v1628_v17, %v1698_v1  ;;  %p2222_p12 = scmp.ne.s32.totalorder %s3395_s27, %s2221_s12  ;;  %p2229_p7 = scmp.lt.s32.totalorder %s2227_s14, %s2221_s12 }
 0x2d6   : > { %v1537_v22 = vpop.permute.xlu1 %1536  ;;  %v1535_v49 = vpop.permute.xlu0 %1534  ;;  %v1521_v13 = vadd.f32 %v1517_v57, %v1501_v19  ;;  %v1520_v40 = vadd.f32 %v1516_v3, %v1500_v18  ;;  %v1691_v32 = vrot.slane %v1628_v17, %v3088_v5  ;;  %v3487_v18 = vld [vmem:[#allocation13_spill] sm:$0xff] }
 0x2d7   : > { %v1544_v24 = vsel %vm928_vm12, %v1535_v49, %v1537_v22  ;;  %v1519_v26 = vadd.f32 %v1515_v25, %v1499_v9  ;;  %v1695_v2 = vrot.slane %v1628_v17, %v1694_v4  ;;  %p2223_p2 = pnand %p2222_p12, %p2423_p5  ;;  %p2230_p8 = por %p2229_p7, %p2228_p4 }
 0x2d8   : > { %v1558_v34 = vmul.f32 %v3485_v45, %v1544_v24  ;;  %v1703_v45 = vrot.slane %v1628_v17, %v1702_v61 }
 0x2d9   : > { %v1709_v19 = vmul.f32 %v1695_v2, %v2679_v43  ;;  %p2224_p3 = pneg %p2223_p2 }
 0x2da   : > { %v1541_v62 = vpop.permute.xlu1 %1540  ;;  %v1539_v56 = vpop.permute.xlu0 %1538  ;;  %v1562_v50 = vadd.f32 %v1558_v34, %v1518_v39  ;;  %v1710_v39 = vmul.f32 %v1699_v41, %v2679_v43  ;;  %v1711_v3 = vmul.f32 %v1703_v45, %v2679_v43 }
 0x2db   : > { %v1545_v48 = vsel %vm928_vm12, %v1541_v62, %v1535_v49  ;;  %v1543_v53 = vsel %vm928_vm12, %v1537_v22, %v1539_v56  ;;  %v1542_v29 = vsel %vm928_vm12, %v1539_v56, %v1541_v62  ;;  %p2231_p11 = pnand %p2230_p8, %p2224_p3 }
 0x2dc   : > { %v1561_v46 = vmul.f32 %v1553_v14, %v1545_v48  ;;  %v1559_v23 = vmul.f32 %v1551_v59, %v1543_v53  ;;  %v1560_v33 = vmul.f32 %v1552_v35, %v1542_v29  ;;  %v1611_v14 = vrot.slane %v2669_v31, %v3088_v5 }
 0x2de   : > { %v1577_v20 = vpop.permute.xlu1 %1576  ;;  %v1575_v22 = vpop.permute.xlu0 %1574  ;;  %v1565_v55 = vadd.f32 %v1561_v46, %v1521_v13  ;;  %v1563_v0 = vadd.f32 %v1559_v23, %v1519_v26  ;;  %v1564_v60 = vadd.f32 %v1560_v33, %v1520_v40 }
 0x2df   : > { %v1584_v49 = vsel %vm957_vm13, %v1575_v22, %v1577_v20 }
 0x2e0   : > { %v1594_v10 = vmul.f32 %v3486_v21, %v1584_v49 }
 0x2e2   : > { %v1581_v30 = vpop.permute.xlu1 %1580  ;;  %v1598_v59 = vadd.f32 %v1594_v10, %v1562_v50  ;;  %v1579_v28 = vpop.permute.xlu0 %1578 }
 0x2e3   : > { %v1585_v37 = vsel %vm957_vm13, %v1581_v30, %v1575_v22  ;;  %v1583_v35 = vsel %vm957_vm13, %v1577_v20, %v1579_v28  ;;  %v1582_v11 = vsel %vm957_vm13, %v1579_v28, %v1581_v30  ;;  %v1708_v22 = vmul.f32 %v1691_v32, %v2679_v43 }
 0x2e4   : > { %v1597_v31 = vmul.f32 %v1589_v38, %v1585_v37  ;;  %v1612_v58 = vadd.f32 %v1611_v14, %v1598_v59  ;;  %v1595_v24 = vmul.f32 %v1587_v6, %v1583_v35  ;;  %v1596_v62 = vmul.f32 %v1588_v36, %v1582_v11 }
 0x2e6   : > { %v1601_v47 = vadd.f32 %v1597_v31, %v1565_v55  ;;  %vm1616_vm5 = vcmp.gt.f32.partialorder %v1612_v58, 0.0  ;;  %v1620_v27 = vmul.f32 0.2, %v1612_v58  ;;  %v1599_v63 = vadd.f32 %v1595_v24, %v1563_v0 }
 0x2e7   : > { %v1600_v15 = vadd.f32 %v1596_v62, %v1564_v60 }
 0x2e8   : > { %v1615_v38 = vadd.f32 %v1611_v14, %v1601_v47  ;;  %v1613_v42 = vadd.f32 %v1611_v14, %v1599_v63  ;;  %v1624_v36 = vsel %vm1616_vm5, %v1612_v58, %v1620_v27 }
 0x2e9   : > { %v1614_v6 = vadd.f32 %v1611_v14, %v1600_v15  ;;  %v1650_v34 = vrot.slane %v1624_v36, %v3088_v5 }
 0x2ea   : > { %vm1619_vm6 = vcmp.gt.f32.partialorder %v1615_v38, 0.0  ;;  %v1623_v56 = vmul.f32 0.2, %v1615_v38  ;;  %vm1617_vm7 = vcmp.gt.f32.partialorder %v1613_v42, 0.0  ;;  %v1621_v12 = vmul.f32 0.2, %v1613_v42 }
 0x2eb   : > { %vm1618_vm8 = vcmp.gt.f32.partialorder %v1614_v6, 0.0  ;;  %v1622_v16 = vmul.f32 0.2, %v1614_v6  ;;  %v1663_v46 = vmul.f32 %v1650_v34, %v2681_v44  ;;  %v1667_v23 = vmul.f32 %v1650_v34, %v3487_v18 }
 0x2ec   : > { %v1627_v52 = vsel %vm1619_vm6, %v1615_v38, %v1623_v56  ;;  %v1625_v48 = vsel %vm1617_vm7, %v1613_v42, %v1621_v12 }
 0x2ed   : > { %v1626_v54 = vsel %vm1618_vm8, %v1614_v6, %v1622_v16  ;;  %v1662_v57 = vrot.slane %v1627_v52, %v3088_v5  ;;  %v1654_v53 = vrot.slane %v1625_v48, %v3088_v5 }
 0x2ee   : > { %v1658_v51 = vrot.slane %v1626_v54, %v3088_v5 }
 0x2ef   : > { %v1664_v25 = vmul.f32 %v1654_v53, %v2681_v44  ;;  %v1666_v20 = vmul.f32 %v1662_v57, %v2681_v44  ;;  %v1668_v49 = vmul.f32 %v1654_v53, %v3487_v18  ;;  %v1670_v13 = vmul.f32 %v1662_v57, %v3487_v18 }
 0x2f0   : > { %v1665_v29 = vmul.f32 %v1658_v51, %v2681_v44  ;;  %v1669_v14 = vmul.f32 %v1658_v51, %v3487_v18  ;;  %v1720_v44 = vadd.f32 %v1708_v22, %v1663_v46 }
 0x2f1   : > { %v1721_v33 = vadd.f32 %v1709_v19, %v1664_v25  ;;  %v1723_v10 = vadd.f32 %v1711_v3, %v1666_v20 }
 0x2f2   : > { %v1722_v21 = vadd.f32 %v1710_v39, %v1665_v29 }
 0x2f3   : > { %v1738_v9 = vpop.permute.xlu1 %1737  ;;  %v1681_v50 = vpop.permute.xlu0 %1680 }
 0x2f4   : > { %v1712_v26 = vmul.f32 %v1691_v32, %v1681_v50  ;;  %v1713_v30 = vmul.f32 %v1695_v2, %v1681_v50  ;;  %v1714_v40 = vmul.f32 %v1699_v41, %v1681_v50  ;;  %v1715_v55 = vmul.f32 %v1703_v45, %v1681_v50 }
 0x2f5   : > { %v1750_v35 = vadd.f32 %v1738_v9, %v1720_v44  ;;  %v1751_v11 = vadd.f32 %v1738_v9, %v1721_v33  ;;  %v1752_v31 = vadd.f32 %v1738_v9, %v1722_v21  ;;  %v1753_v60 = vadd.f32 %v1738_v9, %v1723_v10 }
 0x2f6   : > { %v1724_v43 = vadd.f32 %v1712_v26, %v1667_v23  ;;  %v1725_v28 = vadd.f32 %v1713_v30, %v1668_v49  ;;  %v1726_v37 = vadd.f32 %v1714_v40, %v1669_v14  ;;  %v1727_v0 = vadd.f32 %v1715_v55, %v1670_v13 }
 0x2f7   : > { %v1743_v59 = vpop.permute.xlu1 %1742 }
 0x2f8   : > { %v1754_v58 = vadd.f32 %v1743_v59, %v1724_v43  ;;  %v1755_v24 = vadd.f32 %v1743_v59, %v1725_v28  ;;  %v1756_v62 = vadd.f32 %v1743_v59, %v1726_v37  ;;  %v1757_v47 = vadd.f32 %v1743_v59, %v1727_v0  ;;  %v1645_v27 = vpop.permute.xlu0 %1644 }
 0x2f9   : > { %v1671_v63 = vmul.f32 %v1650_v34, %v1645_v27  ;;  %v1672_v15 = vmul.f32 %v1654_v53, %v1645_v27  ;;  %v1673_v4 = vmul.f32 %v1658_v51, %v1645_v27  ;;  %v1674_v16 = vmul.f32 %v1662_v57, %v1645_v27 }
 0x2fa   : > { %v2078_v1 = vpack.c.bf16 %v1755_v24, %v1751_v11  ;;  %v2082_v17 = vpack.c.bf16 %v1757_v47, %v1753_v60  ;;  %v2080_v42 = vpack.c.bf16 %v1754_v58, %v1750_v35  ;;  %v2084_v6 = vpack.c.bf16 %v1756_v62, %v1752_v31 }
 0x2fb   : > { %v1685_v38 = vpop.permute.xlu1 %1684  ;;  %v2317_v57 = vmov 1966171168  }
 0x2fc   : > { %v1716_v61 = vmul.f32 %v1691_v32, %v1685_v38  ;;  %v1717_v36 = vmul.f32 %v1695_v2, %v1685_v38  ;;  %v1718_v56 = vmul.f32 %v1699_v41, %v1685_v38  ;;  %v1719_v12 = vmul.f32 %v1703_v45, %v1685_v38  ;;  %2079 = vmatprep.subr.bf16.mxu0 %v2078_v1  ;;  %v1762_v2 = vld [vmem:[%s3444_s9] sm:$0x1] }
 0x2fd   : > { %2083 = vmatprep.subr.bf16.mxu1 %v2082_v17  ;;  %2081 = vmatpush1.bf16.msra.mxu0 %v2080_v42  ;;  %v1926_v45 = vunpack.c.l.s4 %v2317_v57 }
 0x2fe   : > { %2085 = vmatpush1.bf16.msra.mxu1 %v2084_v6  ;;  %v1728_v52 = vadd.f32 %v1716_v61, %v1671_v63  ;;  %v1729_v48 = vadd.f32 %v1717_v36, %v1672_v15  ;;  %v1730_v54 = vadd.f32 %v1718_v56, %v1673_v4  ;;  %v1731_v53 = vadd.f32 %v1719_v12, %v1674_v16  ;;  %v1767_v41 = vpop.permute.xlu0 %1766 }
 0x2ff   : > { %v1748_v34 = vpop.permute.xlu1 %1747  ;;  %v1772_v32 = vrot.slane %v1767_v41, %v3088_v5  ;;  %v1927_v19 = vunpack.c.0.s8 %v1926_v45 }
 0x300   : > { %v1758_v51 = vadd.f32 %v1748_v34, %v1728_v52  ;;  %v1759_v25 = vadd.f32 %v1748_v34, %v1729_v48  ;;  %v1760_v29 = vadd.f32 %v1748_v34, %v1730_v54  ;;  %v1761_v20 = vadd.f32 %v1748_v34, %v1731_v53 }
 0x301   : > { %v1930_v23 = vsub.s32 %v1927_v19, %v3081_v7 }
 0x302   : > { %1781 = vmatprep.subr.mxu0 %v1759_v25  ;;  %1852 = vmatprep.subr.mxu1 %v1761_v20 }
 0x303   : > { %1782 = vmatpush1.msra.mxu0 %v1758_v51  ;;  %1853 = vmatpush1.msra.mxu1 %v1760_v29 }
 0x304   : > { %2070 = vmatmul.mubr.msk.f32.vlgmr.msra.gmra.mrb[8].mxu0 %vm1773_vm9, %v1762_v2  ;;  %2071 = vmatmul.mubr.msk.f32.vlgmr.msra.gmra.mrb[8].mxu1 %vm1773_vm9, %v1762_v2 }
 0x3d7   : > { %v1843_v39 = vpop.f32.mrb[8].mxu0  ;;  %v1914_v46 = vpop.f32.mrb[8].mxu1 }
 0x3d8   : > { %v1844_v3 = vadd.f32 %v1843_v39, %v1772_v32  ;;  %v1845_v22 = vpop.f32.mrb[9].mxu0  ;;  %v1915_v9 = vadd.f32 %v1914_v46, %v1772_v32  ;;  %v1916_v49 = vpop.f32.mrb[9].mxu1 }
 0x3d9   : > { %v1846_v18 = vadd.f32 %v1845_v22, %v1772_v32  ;;  %v1917_v13 = vadd.f32 %v1916_v49, %v1772_v32 }
 0x3db   : > { %v1923_v50 = vcombine.low %v1844_v3, %v1846_v18  ;;  %v1924_v33 = vcombine.low %v1915_v9, %v1917_v13 }
 0x3dd   : > { %v1931_v21 = vrot.slane %v1923_v50, %v1930_v23  ;;  %v1938_v10 = vrot.slane %v1924_v33, %v1930_v23 }
 0x3df   : > { %v1939_v5 = vcombine.low %v1931_v21, %v1938_v10 }
 0x3e1   : > { %v1946_v14 = vrot.slane %v1939_v5, %v1930_v23 }
 0x3e3   : > { %1952 = vst.msk [vmem:[%s410_s20] sm:$0xf] %vm1950_vm10, %v1946_v14 }
 0x3e4   : > { %2234 = shalt.err (!%p2231_p11)
}
 0x3e5   : > { %s2235_s16 = scalar_lea.hbm %s3393_s18, 64  ;;  %s2239_s20 = scalar_lea.hbm %s3445_s11, 128 }
 0x3e6   : > { %p2236_p13 = scmp.ne.s32.totalorder %s3393_s18, %s2235_s16  ;;  %p2240_p6 = scmp.lt.u32.totalorder %s3393_s18, %s3445_s11 }
 0x3e7   : > { %p2241_p9 = scmp.lt.u32.totalorder %s2239_s20, %s2235_s16  ;;  %p2243_p12 = scmp.lt.u32.totalorder %s2235_s16, %s3393_s18 }
 0x3e8   : > { %p2237_p0 = pnand %p2236_p13, %p2423_p5 }
 0x3e9   : > { %p2242_p10 = por %p2241_p9, %p2240_p6 }
 0x3ea   : > { %p2238_p1 = pneg %p2237_p0 }
 0x3eb   : > { %p2244_p2 = por %p2243_p12, %p2242_p10 }
 0x3ed   : > { %p2245_p3 = pnand %p2244_p2, %p2238_p1 }
 0x3ef   : > { %2248 = shalt.err (!%p2245_p3)
}
 0x3f0   : > { %2094 = dma.vmem_to_hbm [thread:$0]  (%p2423_p5), %s3395_s27, 64, %s3393_s18, %s1954_s13  }
 0x3f1 PF: > { %p2111_p4 = scmp.ge.s32.totalorder %s2291_s24, 2  ;;  %s1980_s12 = sand.u32 1, %s2279_s21  }
 0x3f2   : > { %p3488_p7 = scmp.ne.s32.totalorder %s3454_s30, 0  ;;  %s1981_s6 = scalar_lea.sflag [#allocation6], %s1980_s12 }
 0x3f4   : > { %p2104_p8 = pnand %p2111_p4, %p3488_p7 }
 0x3f6   : > { %2274 = dma.done.wait (!%p2104_p8), %s1981_s6, 64  }
 0x3f7   : > { %2276 = vsyncadd (!%p2104_p8), %s1981_s6, 4294967232  ;;  %p27_p11 = scmp.ge.s32.totalorder %s2410_s25, 4   ;;  %s3489_s21 = smov %s2283_s22 }
 0x3f8   : > { %s3490_s22 = smov %s2287_s23  ;;  %s3491_s23 = smov %s2421_s28 }
 0x3f9   : > { %s3492_s24 = smov %s2410_s25  ;;  %29 = sbr.rel (!%p27_p11) target bundleno = 8 (0x8), region = 109 }
 0x400   :  { %1986 = vsyncpa [#allocation5], 1 }
 0x401   :  { %1988 = vsyncpa [#allocation5 + $0x1], 1 }
 0x402   :  { %1989 = vsyncpa [#allocation6], 1 }
 0x403   :  { %1991 = vsyncpa [#allocation6 + $0x1], 1 }
 0x404   :  { %1992 = vsyncpa [#allocation7], 1 }
 0x405   :  { %1994 = vsyncpa [#allocation7 + $0x1], 1 }

</bundles_post_ra>
